<compile_context>
chip_gen: v7x
topology: tpu7x:2x2x1
jax: 0.10.0
libtpu: 0.0.40
codegen_flags: <defaults>
</compile_context>

<pallas_src>
import functools
import math

import jax
import jax.numpy as jnp
from jax.experimental import pallas as pl
from jax.experimental.pallas import tpu as pltpu

HIDDEN = 32          # opt.hiddenSize
N_NODE = 64          # n_node (embedding vocab)
STEP = 1             # opt.step -> GatedGraphConv has STEP + 1 layers
NUM_GG_LAYERS = 2    # GlobalGraph.num_layers


# --------------------------------------------------------------------------
# Fused Pallas kernel: the whole SessionGraph.forward
# --------------------------------------------------------------------------

def _fused_forward_kernel(
        emb_ref,
        s_idx_ref, s_src_ref, s_dst_ref,
        c1_waug_ref, c1_vsrc_ref, c1_bias_ref,
        ggcw_ref, wih_ref, whh_ref, bih_ref, bhh_ref,
        g_idx_ref, g_src_ref, g_dst_ref,
        gg_waug_ref, gg_vsrc_ref, gg_bias_ref,
        sage_wl_ref, sage_bl_ref, sage_wr_ref,
        hidden_out_ref, pad_out_ref, gh_out_ref,
        *, hidden, step, n_dst, negative_slope, gg_apply_relu):
    H = hidden
    emb = emb_ref[...]                                        # (N_NODE, H)

    def embed(idx_ref):
        # embedding lookup as one-hot @ table (no XLA gather)
        n = idx_ref.shape[0]
        oh = (idx_ref[...] ==
              jax.lax.broadcasted_iota(jnp.int32, (n, emb.shape[0]), 1)
              ).astype(jnp.float32)                           # (n, N_NODE)
        return jnp.dot(oh, emb, preferred_element_type=jnp.float32)

    def dense_adj(src_ref, dst_ref, n):
        # adj[i, j] = #edges j -> i  (padded edges carry index -1 -> contribute 0)
        e_num = src_ref.shape[0]
        oh_src = (src_ref[...] ==
                  jax.lax.broadcasted_iota(jnp.int32, (e_num, n), 1)
                  ).astype(jnp.float32)                       # (E, n)
        oh_dst_t = (jax.lax.broadcasted_iota(jnp.int32, (n, e_num), 0) ==
                    dst_ref[...]).astype(jnp.float32)         # (n, E)
        return jnp.dot(oh_dst_t, oh_src, preferred_element_type=jnp.float32)

    def with_unit_diag(adj):
        # GATConv removes existing self-loops and adds exactly one per node
        n = adj.shape[0]
        ri = jax.lax.broadcasted_iota(jnp.int32, (n, n), 0)
        ci = jax.lax.broadcasted_iota(jnp.int32, (n, n), 1)
        return jnp.where(ri == ci, 1.0, adj)

    def gat(x, adj_sl, waug_ref, vsrc_ref, bias_ref):
        # GATConv (heads=1); attention projections folded into one matmul
        xaug = jnp.dot(x, waug_ref[...], preferred_element_type=jnp.float32)
        xw = xaug[:, :H]
        a_dst = xaug[:, H:H + 1]                              # (n, 1)
        a_src = jax.lax.dot_general(vsrc_ref[...], x, (((1,), (1,)), ((), ())),
                                    preferred_element_type=jnp.float32)  # (1, n)
        e = a_dst + a_src                                     # e[i, j]
        e = jnp.where(e > 0, e, negative_slope * e)           # leaky relu
        e = jnp.where(adj_sl > 0.0, e, -1e30)
        e = e - jnp.max(e, axis=-1, keepdims=True)
        p = adj_sl * jnp.exp(e)                               # multi-edge counts
        alpha = p / (jnp.sum(p, axis=-1, keepdims=True) + 1e-16)
        return (jnp.dot(alpha, xw, preferred_element_type=jnp.float32)
                + bias_ref[...])

    # ---- session branch: relu(GATConv) -> relu(GatedGraphConv, step+1 layers) ----
    n_s = s_idx_ref.shape[0]
    x_s = embed(s_idx_ref)
    adj_s = dense_adj(s_src_ref, s_dst_ref, n_s)
    h = jnp.maximum(gat(x_s, with_unit_diag(adj_s),
                        c1_waug_ref, c1_vsrc_ref, c1_bias_ref), 0.0)
    for layer in range(step + 1):                             # static unroll
        hw = jnp.dot(h, ggcw_ref[layer], preferred_element_type=jnp.float32)
        m = jnp.dot(adj_s, hw, preferred_element_type=jnp.float32)
        r = jax.nn.sigmoid(
            jnp.dot(m, wih_ref[0], preferred_element_type=jnp.float32) + bih_ref[0]
            + jnp.dot(h, whh_ref[0], preferred_element_type=jnp.float32) + bhh_ref[0])
        z = jax.nn.sigmoid(
            jnp.dot(m, wih_ref[1], preferred_element_type=jnp.float32) + bih_ref[1]
            + jnp.dot(h, whh_ref[1], preferred_element_type=jnp.float32) + bhh_ref[1])
        ng = jnp.tanh(
            jnp.dot(m, wih_ref[2], preferred_element_type=jnp.float32) + bih_ref[2]
            + r * (jnp.dot(h, whh_ref[2], preferred_element_type=jnp.float32)
                   + bhh_ref[2]))
        h = (1.0 - z) * ng + z * h
    hidden_out_ref[...] = jnp.maximum(h, 0.0)

    # ---- pad = embedding(0) ----
    pad_out_ref[...] = emb[0:1, :]

    # ---- global-graph branch (last hop only): GATConv -> SAGEConv(mean, L2-norm) ----
    n_g = g_idx_ref.shape[0]
    x_g = embed(g_idx_ref)
    adj_g = dense_adj(g_src_ref, g_dst_ref, n_g)
    xg = gat(x_g, with_unit_diag(adj_g), gg_waug_ref, gg_vsrc_ref, gg_bias_ref)
    deg = jnp.sum(adj_g, axis=-1, keepdims=True)
    adjm = adj_g / jnp.maximum(deg, 1.0)                      # mean aggregation
    agg = jnp.dot(adjm, xg, preferred_element_type=jnp.float32)
    out = (jnp.dot(agg, sage_wl_ref[...], preferred_element_type=jnp.float32)
           + sage_bl_ref[...]
           + jnp.dot(xg, sage_wr_ref[...], preferred_element_type=jnp.float32))
    norm = jnp.sqrt(jnp.sum(out * out, axis=-1, keepdims=True))
    out = out / jnp.maximum(norm, 1e-12)
    if gg_apply_relu:
        out = jnp.maximum(out, 0.0)
    gh_out_ref[...] = out[:n_dst]


# --------------------------------------------------------------------------
# Plain-JAX glue (only reshapes / padding -- no gathers, no scatters)
# --------------------------------------------------------------------------

def _vmem_spec():
    return pl.BlockSpec(memory_space=pltpu.MemorySpace.VMEM)


def _pad_edges(edge_index, multiple=8):
    """Pad the edge list to a multiple-of-8 length with index -1 (no-op edges)."""
    e = edge_index.shape[1]
    e_pad = ((e + multiple - 1) // multiple) * multiple
    if e_pad != e:
        pad = jnp.full((2, e_pad - e), -1, edge_index.dtype)
        edge_index = jnp.concatenate([edge_index, pad], axis=1)
    return edge_index


def _edge_cols(edge_index):
    """src as (E, 1) int32 and dst as (1, E) int32 for in-kernel one-hot builds."""
    edge_index = _pad_edges(edge_index)
    src = edge_index[0].reshape(-1, 1).astype(jnp.int32)
    dst = edge_index[1].reshape(1, -1).astype(jnp.int32)
    return src, dst


def init_params(key):
    # matches SessionGraph.reset_parameters(): uniform(-stdv, stdv), stdv = 1/sqrt(H)
    stdv = 1.0 / math.sqrt(HIDDEN)
    keys = iter(jax.random.split(key, 64))

    def nxt(shape):
        return jax.random.uniform(next(keys), shape, jnp.float32, -stdv, stdv)

    def gat_p():
        w = nxt((HIDDEN, HIDDEN))          # lin.weight^T  (in, out)
        att_src = nxt((1, HIDDEN))
        att_dst = nxt((1, HIDDEN))
        bias = nxt((1, HIDDEN))
        # fold attention projections: x @ waug -> [x@W | x@(W@att_dst^T)]
        waug = jnp.concatenate([w, jnp.dot(w, att_dst.T)], axis=1)   # (H, H+1)
        vsrc = jnp.dot(w, att_src.T).T                               # (1, H)
        return {"waug": waug, "vsrc": vsrc, "bias": bias}

    params = {
        "embedding": nxt((N_NODE, HIDDEN)),
        "gnn_conv1": gat_p(),                          # GNN.conv1 (GATConv, heads=1)
        "ggnn": {                                      # GatedGraphConv(H, STEP+1)
            "weight": nxt((STEP + 1, HIDDEN, HIDDEN)),
            "w_ih3": nxt((3, HIDDEN, HIDDEN)),         # GRUCell weight_ih^T, split [r,z,n]
            "w_hh3": nxt((3, HIDDEN, HIDDEN)),         # GRUCell weight_hh^T, split [r,z,n]
            "b_ih3": nxt((3, 1, HIDDEN)),
            "b_hh3": nxt((3, 1, HIDDEN)),
        },
        "gg_gat": gat_p(),                             # GlobalGraph.gat
        "sage": [{"w_l": nxt((HIDDEN, HIDDEN)),        # lin_l.weight^T
                  "b_l": nxt((1, HIDDEN)),
                  "w_r": nxt((HIDDEN, HIDDEN))}        # lin_r.weight^T (no bias)
                 for _ in range(NUM_GG_LAYERS)],       # GlobalGraph.convs
    }
    return params


def session_graph_forward(params, inputs, A, edge_index, g_samplers, unique=False):
    del A  # unused by the reference GNN.forward as well

    # emulate the reference sampler loop (the last tuple wins)
    g_adjs, n_idxs = None, None
    for _b_size, node_idx, adjs in g_samplers:
        g_adjs = adjs
        n_idxs = node_idx

    # The reference resets x = x_all at the top of every hop, so only the last
    # hop's output survives (xs only gets the final x) -> compute that hop only.
    i_last = len(g_adjs) - 1
    g_edge_index, _, g_size = g_adjs[i_last]
    n_dst = int(g_size[1])
    gg_apply_relu = (i_last != NUM_GG_LAYERS - 1)

    s_idx = jnp.asarray(inputs, jnp.int32).reshape(-1, 1)
    g_idx = jnp.asarray(n_idxs, jnp.int32).reshape(-1, 1)
    s_src, s_dst = _edge_cols(edge_index)
    g_src, g_dst = _edge_cols(g_edge_index)

    c1 = params["gnn_conv1"]
    gg = params["ggnn"]
    gat2 = params["gg_gat"]
    sage = params["sage"][i_last]

    n_sess = s_idx.shape[0]
    kernel = functools.partial(
        _fused_forward_kernel, hidden=HIDDEN, step=STEP, n_dst=n_dst,
        negative_slope=0.2, gg_apply_relu=gg_apply_relu)

    hidden, pad, g_hidden = pl.pallas_call(
        kernel,
        out_shape=(jax.ShapeDtypeStruct((n_sess, HIDDEN), jnp.float32),
                   jax.ShapeDtypeStruct((1, HIDDEN), jnp.float32),
                   jax.ShapeDtypeStruct((n_dst, HIDDEN), jnp.float32)),
        in_specs=[_vmem_spec() for _ in range(21)],
        out_specs=[_vmem_spec(), _vmem_spec(), _vmem_spec()],
    )(params["embedding"], s_idx, s_src, s_dst,
      c1["waug"], c1["vsrc"], c1["bias"],
      gg["weight"], gg["w_ih3"], gg["w_hh3"], gg["b_ih3"], gg["b_hh3"],
      g_idx, g_src, g_dst,
      gat2["waug"], gat2["vsrc"], gat2["bias"],
      sage["w_l"], sage["b_l"], sage["w_r"])

    if unique:
        # TODO(synk): data-dependent `(n_idxs == i).nonzero()[0][0]` index_select path
        g_h = g_hidden
    else:
        g_h = g_hidden
    return hidden, pad, g_h


# --------------------------------------------------------------------------
# Example run
# --------------------------------------------------------------------------

if __name__ == "__main__":
    key = jax.random.PRNGKey(0)
    pkey, ikey, akey, gkey = jax.random.split(key, 4)
    params = init_params(pkey)

    n_sess = 8
    inputs = jax.random.randint(ikey, (n_sess,), 1, N_NODE).astype(jnp.int32)
    # A is part of the signature but unused by GNN.forward (matches reference)
    A = jax.random.uniform(akey, (1, n_sess, 2 * n_sess), jnp.float32)

    # session-graph edges (consecutive items), shape (2, E) = (src, dst)
    edge_index = jnp.stack([jnp.arange(n_sess - 1, dtype=jnp.int32),
                            jnp.arange(1, n_sess, dtype=jnp.int32)], axis=0)

    # synthetic NeighborSampler output: one (batch_size, node_idx, adjs) tuple,
    # adjs = [(edge_index, e_id, size), ...] for 2 hops
    n_g = 16
    node_idx = jax.random.randint(gkey, (n_g,), 1, N_NODE).astype(jnp.int32)

    def rand_edges(k, n_src, n_dst_, e):
        s = jax.random.randint(k, (e,), 0, n_src).astype(jnp.int32)
        d = jax.random.randint(jax.random.fold_in(k, 7), (e,), 0, n_dst_).astype(jnp.int32)
        return jnp.stack([s, d], axis=0)

    adjs = [
        (rand_edges(jax.random.fold_in(gkey, 1), n_g, 12, 24), None, (n_g, 12)),
        (rand_edges(jax.random.fold_in(gkey, 2), n_g, 8, 16), None, (n_g, 8)),
    ]
    g_samplers = [(n_sess, node_idx, adjs)]

    hidden, pad, g_h = session_graph_forward(params, inputs, A, edge_index, g_samplers)
    jax.block_until_ready((hidden, pad, g_h))
    assert hidden.shape == (n_sess, HIDDEN)
    assert pad.shape == (1, HIDDEN)
    assert g_h.shape == (8, HIDDEN)
    print("KERNEL_OK")
</pallas_src>

<mosaic_0001>
module attributes {stable_mosaic.version = 11 : i64} {
  func.func @_fused_forward_kernel(%arg0: memref<64x32xf32, #tpu.memory_space<vmem>>, %arg1: memref<8x1xi32, #tpu.memory_space<vmem>>, %arg2: memref<8x1xi32, #tpu.memory_space<vmem>>, %arg3: memref<1x8xi32, #tpu.memory_space<vmem>>, %arg4: memref<32x33xf32, #tpu.memory_space<vmem>>, %arg5: memref<1x32xf32, #tpu.memory_space<vmem>>, %arg6: memref<1x32xf32, #tpu.memory_space<vmem>>, %arg7: memref<2x32x32xf32, #tpu.memory_space<vmem>>, %arg8: memref<3x32x32xf32, #tpu.memory_space<vmem>>, %arg9: memref<3x32x32xf32, #tpu.memory_space<vmem>>, %arg10: memref<3x1x32xf32, #tpu.memory_space<vmem>>, %arg11: memref<3x1x32xf32, #tpu.memory_space<vmem>>, %arg12: memref<16x1xi32, #tpu.memory_space<vmem>>, %arg13: memref<16x1xi32, #tpu.memory_space<vmem>>, %arg14: memref<1x16xi32, #tpu.memory_space<vmem>>, %arg15: memref<32x33xf32, #tpu.memory_space<vmem>>, %arg16: memref<1x32xf32, #tpu.memory_space<vmem>>, %arg17: memref<1x32xf32, #tpu.memory_space<vmem>>, %arg18: memref<32x32xf32, #tpu.memory_space<vmem>>, %arg19: memref<1x32xf32, #tpu.memory_space<vmem>>, %arg20: memref<32x32xf32, #tpu.memory_space<vmem>>, %arg21: memref<8x32xf32, #tpu.memory_space<vmem>>, %arg22: memref<1x32xf32, #tpu.memory_space<vmem>>, %arg23: memref<8x32xf32, #tpu.memory_space<vmem>>) attributes {dimension_semantics = [], scalar_prefetch = 0 : i64, scratch_operands = 0 : i64, tpu.core_type = #tpu.core_type<tc>} {
    %c0 = arith.constant 0 : index
    %c0_0 = arith.constant 0 : index
    %0 = vector.load %arg0[%c0, %c0_0] : memref<64x32xf32, #tpu.memory_space<vmem>>, vector<64x32xf32>
    %c0_1 = arith.constant 0 : index
    %c0_2 = arith.constant 0 : index
    %1 = vector.load %arg1[%c0_1, %c0_2] : memref<8x1xi32, #tpu.memory_space<vmem>>, vector<8x1xi32>
    %2 = tpu.iota {dimensions = array<i32: 1>} : vector<8x64xi32>
    %3 = vector.broadcast %1 : vector<8x1xi32> to vector<8x64xi32>
    %4 = arith.cmpi eq, %3, %2 : vector<8x64xi32>
    %5 = arith.extui %4 : vector<8x64xi1> to vector<8x64xi32>
    %6 = arith.sitofp %5 : vector<8x64xi32> to vector<8x64xf32>
    %cst = arith.constant dense<0.000000e+00> : vector<8x32xf32>
    %7 = tpu.matmul %6, %0, %cst {dimension_numbers = #tpu.dot_dimension_numbers<[1], [0], [0], [1], [0, 0, 1, 1], [], []>} : vector<8x64xf32>, vector<64x32xf32>, vector<8x32xf32> -> vector<8x32xf32>
    %c0_3 = arith.constant 0 : index
    %c0_4 = arith.constant 0 : index
    %8 = vector.load %arg2[%c0_3, %c0_4] : memref<8x1xi32, #tpu.memory_space<vmem>>, vector<8x1xi32>
    %9 = tpu.iota {dimensions = array<i32: 1>} : vector<8x8xi32>
    %10 = vector.broadcast %8 : vector<8x1xi32> to vector<8x8xi32>
    %11 = arith.cmpi eq, %10, %9 : vector<8x8xi32>
    %12 = arith.extui %11 : vector<8x8xi1> to vector<8x8xi32>
    %13 = arith.sitofp %12 : vector<8x8xi32> to vector<8x8xf32>
    %14 = tpu.iota {dimensions = array<i32: 0>} : vector<8x8xi32>
    %c0_5 = arith.constant 0 : index
    %c0_6 = arith.constant 0 : index
    %15 = vector.load %arg3[%c0_5, %c0_6] : memref<1x8xi32, #tpu.memory_space<vmem>>, vector<1x8xi32>
    %16 = vector.broadcast %15 : vector<1x8xi32> to vector<8x8xi32>
    %17 = arith.cmpi eq, %14, %16 : vector<8x8xi32>
    %18 = arith.extui %17 : vector<8x8xi1> to vector<8x8xi32>
    %19 = arith.sitofp %18 : vector<8x8xi32> to vector<8x8xf32>
    %cst_7 = arith.constant dense<0.000000e+00> : vector<8x8xf32>
    %20 = tpu.matmul %19, %13, %cst_7 {dimension_numbers = #tpu.dot_dimension_numbers<[1], [0], [0], [1], [0, 0, 1, 1], [], []>} : vector<8x8xf32>, vector<8x8xf32>, vector<8x8xf32> -> vector<8x8xf32>
    %21 = tpu.iota {dimensions = array<i32: 0>} : vector<8x8xi32>
    %22 = tpu.iota {dimensions = array<i32: 1>} : vector<8x8xi32>
    %23 = arith.cmpi eq, %21, %22 : vector<8x8xi32>
    %cst_8 = arith.constant 1.000000e+00 : f32
    %24 = vector.broadcast %cst_8 : f32 to vector<8x8xf32>
    %25 = arith.select %23, %24, %20 : vector<8x8xi1>, vector<8x8xf32>
    %c0_9 = arith.constant 0 : index
    %c0_10 = arith.constant 0 : index
    %26 = vector.load %arg4[%c0_9, %c0_10] : memref<32x33xf32, #tpu.memory_space<vmem>>, vector<32x33xf32>
    %cst_11 = arith.constant dense<0.000000e+00> : vector<8x33xf32>
    %27 = tpu.matmul %7, %26, %cst_11 {dimension_numbers = #tpu.dot_dimension_numbers<[1], [0], [0], [1], [0, 0, 1, 1], [], []>} : vector<8x32xf32>, vector<32x33xf32>, vector<8x33xf32> -> vector<8x33xf32>
    %28 = vector.extract_strided_slice %27 {offsets = [0, 0], sizes = [8, 32], strides = [1, 1]} : vector<8x33xf32> to vector<8x32xf32>
    %29 = vector.extract_strided_slice %27 {offsets = [0, 32], sizes = [8, 1], strides = [1, 1]} : vector<8x33xf32> to vector<8x1xf32>
    %c0_12 = arith.constant 0 : index
    %c0_13 = arith.constant 0 : index
    %30 = vector.load %arg5[%c0_12, %c0_13] : memref<1x32xf32, #tpu.memory_space<vmem>>, vector<1x32xf32>
    %cst_14 = arith.constant dense<0.000000e+00> : vector<1x8xf32>
    %31 = tpu.matmul %30, %7, %cst_14 {dimension_numbers = #tpu.dot_dimension_numbers<[1], [1], [0], [0], [0, 0, 1, 0], [], []>} : vector<1x32xf32>, vector<8x32xf32>, vector<1x8xf32> -> vector<1x8xf32>
    %32 = vector.broadcast %29 : vector<8x1xf32> to vector<8x8xf32>
    %33 = vector.broadcast %31 : vector<1x8xf32> to vector<8x8xf32>
    %34 = arith.addf %32, %33 : vector<8x8xf32>
    %cst_15 = arith.constant 0.000000e+00 : f32
    %35 = vector.broadcast %cst_15 : f32 to vector<8x8xf32>
    %36 = arith.cmpf ogt, %34, %35 : vector<8x8xf32>
    %cst_16 = arith.constant 2.000000e-01 : f32
    %37 = vector.broadcast %cst_16 : f32 to vector<8x8xf32>
    %38 = arith.mulf %37, %34 : vector<8x8xf32>
    %39 = arith.select %36, %34, %38 : vector<8x8xi1>, vector<8x8xf32>
    %cst_17 = arith.constant 0.000000e+00 : f32
    %40 = vector.broadcast %cst_17 : f32 to vector<8x8xf32>
    %41 = arith.cmpf ogt, %25, %40 : vector<8x8xf32>
    %cst_18 = arith.constant -1.000000e+30 : f32
    %42 = vector.broadcast %cst_18 : f32 to vector<8x8xf32>
    %43 = arith.select %41, %39, %42 : vector<8x8xi1>, vector<8x8xf32>
    %cst_19 = arith.constant dense<0xFF800000> : vector<8xf32>
    %44 = vector.multi_reduction <maximumf>, %43, %cst_19 [1] : vector<8x8xf32> to vector<8xf32>
    %45 = vector.shape_cast %44 : vector<8xf32> to vector<8x1xf32>
    %46 = vector.broadcast %45 : vector<8x1xf32> to vector<8x8xf32>
    %47 = arith.subf %43, %46 : vector<8x8xf32>
    %48 = math.exp %47 : vector<8x8xf32>
    %49 = arith.mulf %25, %48 : vector<8x8xf32>
    %cst_20 = arith.constant dense<0.000000e+00> : vector<8xf32>
    %50 = vector.multi_reduction <add>, %49, %cst_20 [1] : vector<8x8xf32> to vector<8xf32>
    %51 = vector.shape_cast %50 : vector<8xf32> to vector<8x1xf32>
    %cst_21 = arith.constant 1.000000e-16 : f32
    %52 = vector.broadcast %cst_21 : f32 to vector<8x1xf32>
    %53 = arith.addf %51, %52 : vector<8x1xf32>
    %54 = vector.broadcast %53 : vector<8x1xf32> to vector<8x8xf32>
    %55 = arith.divf %49, %54 : vector<8x8xf32>
    %cst_22 = arith.constant dense<0.000000e+00> : vector<8x32xf32>
    %56 = tpu.matmul %55, %28, %cst_22 {dimension_numbers = #tpu.dot_dimension_numbers<[1], [0], [0], [1], [0, 0, 1, 1], [], []>} : vector<8x8xf32>, vector<8x32xf32>, vector<8x32xf32> -> vector<8x32xf32>
    %c0_23 = arith.constant 0 : index
    %c0_24 = arith.constant 0 : index
    %57 = vector.load %arg6[%c0_23, %c0_24] : memref<1x32xf32, #tpu.memory_space<vmem>>, vector<1x32xf32>
    %58 = vector.broadcast %57 : vector<1x32xf32> to vector<8x32xf32>
    %59 = arith.addf %56, %58 : vector<8x32xf32>
    %cst_25 = arith.constant 0.000000e+00 : f32
    %60 = vector.broadcast %cst_25 : f32 to vector<8x32xf32>
    %61 = arith.maximumf %59, %60 : vector<8x32xf32>
    %c0_26 = arith.constant 0 : index
    %c0_27 = arith.constant 0 : index
    %c0_28 = arith.constant 0 : index
    %62 = vector.load %arg7[%c0_26, %c0_27, %c0_28] : memref<2x32x32xf32, #tpu.memory_space<vmem>>, vector<1x32x32xf32>
    %63 = vector.shape_cast %62 : vector<1x32x32xf32> to vector<32x32xf32>
    %cst_29 = arith.constant dense<0.000000e+00> : vector<8x32xf32>
    %64 = tpu.matmul %61, %63, %cst_29 {dimension_numbers = #tpu.dot_dimension_numbers<[1], [0], [0], [1], [0, 0, 1, 1], [], []>} : vector<8x32xf32>, vector<32x32xf32>, vector<8x32xf32> -> vector<8x32xf32>
    %cst_30 = arith.constant dense<0.000000e+00> : vector<8x32xf32>
    %65 = tpu.matmul %20, %64, %cst_30 {dimension_numbers = #tpu.dot_dimension_numbers<[1], [0], [0], [1], [0, 0, 1, 1], [], []>} : vector<8x8xf32>, vector<8x32xf32>, vector<8x32xf32> -> vector<8x32xf32>
    %c0_31 = arith.constant 0 : index
    %c0_32 = arith.constant 0 : index
    %c0_33 = arith.constant 0 : index
    %66 = vector.load %arg8[%c0_31, %c0_32, %c0_33] : memref<3x32x32xf32, #tpu.memory_space<vmem>>, vector<1x32x32xf32>
    %67 = vector.shape_cast %66 : vector<1x32x32xf32> to vector<32x32xf32>
    %cst_34 = arith.constant dense<0.000000e+00> : vector<8x32xf32>
    %68 = tpu.matmul %65, %67, %cst_34 {dimension_numbers = #tpu.dot_dimension_numbers<[1], [0], [0], [1], [0, 0, 1, 1], [], []>} : vector<8x32xf32>, vector<32x32xf32>, vector<8x32xf32> -> vector<8x32xf32>
    %c0_35 = arith.constant 0 : index
    %c0_36 = arith.constant 0 : index
    %c0_37 = arith.constant 0 : index
    %69 = vector.load %arg10[%c0_35, %c0_36, %c0_37] : memref<3x1x32xf32, #tpu.memory_space<vmem>>, vector<1x1x32xf32>
    %70 = vector.shape_cast %69 : vector<1x1x32xf32> to vector<1x32xf32>
    %71 = vector.broadcast %70 : vector<1x32xf32> to vector<8x32xf32>
    %72 = arith.addf %68, %71 : vector<8x32xf32>
    %c0_38 = arith.constant 0 : index
    %c0_39 = arith.constant 0 : index
    %c0_40 = arith.constant 0 : index
    %73 = vector.load %arg9[%c0_38, %c0_39, %c0_40] : memref<3x32x32xf32, #tpu.memory_space<vmem>>, vector<1x32x32xf32>
    %74 = vector.shape_cast %73 : vector<1x32x32xf32> to vector<32x32xf32>
    %cst_41 = arith.constant dense<0.000000e+00> : vector<8x32xf32>
    %75 = tpu.matmul %61, %74, %cst_41 {dimension_numbers = #tpu.dot_dimension_numbers<[1], [0], [0], [1], [0, 0, 1, 1], [], []>} : vector<8x32xf32>, vector<32x32xf32>, vector<8x32xf32> -> vector<8x32xf32>
    %76 = arith.addf %72, %75 : vector<8x32xf32>
    %c0_42 = arith.constant 0 : index
    %c0_43 = arith.constant 0 : index
    %c0_44 = arith.constant 0 : index
    %77 = vector.load %arg11[%c0_42, %c0_43, %c0_44] : memref<3x1x32xf32, #tpu.memory_space<vmem>>, vector<1x1x32xf32>
    %78 = vector.shape_cast %77 : vector<1x1x32xf32> to vector<1x32xf32>
    %79 = vector.broadcast %78 : vector<1x32xf32> to vector<8x32xf32>
    %80 = arith.addf %76, %79 : vector<8x32xf32>
    %81 = arith.negf %80 : vector<8x32xf32>
    %82 = math.exp %81 : vector<8x32xf32>
    %cst_45 = arith.constant 1.000000e+00 : f32
    %83 = vector.broadcast %cst_45 : f32 to vector<8x32xf32>
    %84 = arith.addf %83, %82 : vector<8x32xf32>
    %85 = arith.divf %83, %84 : vector<8x32xf32>
    %c1 = arith.constant 1 : index
    %c0_46 = arith.constant 0 : index
    %c0_47 = arith.constant 0 : index
    %86 = vector.load %arg8[%c1, %c0_46, %c0_47] : memref<3x32x32xf32, #tpu.memory_space<vmem>>, vector<1x32x32xf32>
    %87 = vector.shape_cast %86 : vector<1x32x32xf32> to vector<32x32xf32>
    %cst_48 = arith.constant dense<0.000000e+00> : vector<8x32xf32>
    %88 = tpu.matmul %65, %87, %cst_48 {dimension_numbers = #tpu.dot_dimension_numbers<[1], [0], [0], [1], [0, 0, 1, 1], [], []>} : vector<8x32xf32>, vector<32x32xf32>, vector<8x32xf32> -> vector<8x32xf32>
    %c1_49 = arith.constant 1 : index
    %c0_50 = arith.constant 0 : index
    %c0_51 = arith.constant 0 : index
    %89 = vector.load %arg10[%c1_49, %c0_50, %c0_51] : memref<3x1x32xf32, #tpu.memory_space<vmem>>, vector<1x1x32xf32>
    %90 = vector.shape_cast %89 : vector<1x1x32xf32> to vector<1x32xf32>
    %91 = vector.broadcast %90 : vector<1x32xf32> to vector<8x32xf32>
    %92 = arith.addf %88, %91 : vector<8x32xf32>
    %c1_52 = arith.constant 1 : index
    %c0_53 = arith.constant 0 : index
    %c0_54 = arith.constant 0 : index
    %93 = vector.load %arg9[%c1_52, %c0_53, %c0_54] : memref<3x32x32xf32, #tpu.memory_space<vmem>>, vector<1x32x32xf32>
    %94 = vector.shape_cast %93 : vector<1x32x32xf32> to vector<32x32xf32>
    %cst_55 = arith.constant dense<0.000000e+00> : vector<8x32xf32>
    %95 = tpu.matmul %61, %94, %cst_55 {dimension_numbers = #tpu.dot_dimension_numbers<[1], [0], [0], [1], [0, 0, 1, 1], [], []>} : vector<8x32xf32>, vector<32x32xf32>, vector<8x32xf32> -> vector<8x32xf32>
    %96 = arith.addf %92, %95 : vector<8x32xf32>
    %c1_56 = arith.constant 1 : index
    %c0_57 = arith.constant 0 : index
    %c0_58 = arith.constant 0 : index
    %97 = vector.load %arg11[%c1_56, %c0_57, %c0_58] : memref<3x1x32xf32, #tpu.memory_space<vmem>>, vector<1x1x32xf32>
    %98 = vector.shape_cast %97 : vector<1x1x32xf32> to vector<1x32xf32>
    %99 = vector.broadcast %98 : vector<1x32xf32> to vector<8x32xf32>
    %100 = arith.addf %96, %99 : vector<8x32xf32>
    %101 = arith.negf %100 : vector<8x32xf32>
    %102 = math.exp %101 : vector<8x32xf32>
    %cst_59 = arith.constant 1.000000e+00 : f32
    %103 = vector.broadcast %cst_59 : f32 to vector<8x32xf32>
    %104 = arith.addf %103, %102 : vector<8x32xf32>
    %105 = arith.divf %103, %104 : vector<8x32xf32>
    %c2 = arith.constant 2 : index
    %c0_60 = arith.constant 0 : index
    %c0_61 = arith.constant 0 : index
    %106 = vector.load %arg8[%c2, %c0_60, %c0_61] : memref<3x32x32xf32, #tpu.memory_space<vmem>>, vector<1x32x32xf32>
    %107 = vector.shape_cast %106 : vector<1x32x32xf32> to vector<32x32xf32>
    %cst_62 = arith.constant dense<0.000000e+00> : vector<8x32xf32>
    %108 = tpu.matmul %65, %107, %cst_62 {dimension_numbers = #tpu.dot_dimension_numbers<[1], [0], [0], [1], [0, 0, 1, 1], [], []>} : vector<8x32xf32>, vector<32x32xf32>, vector<8x32xf32> -> vector<8x32xf32>
    %c2_63 = arith.constant 2 : index
    %c0_64 = arith.constant 0 : index
    %c0_65 = arith.constant 0 : index
    %109 = vector.load %arg10[%c2_63, %c0_64, %c0_65] : memref<3x1x32xf32, #tpu.memory_space<vmem>>, vector<1x1x32xf32>
    %110 = vector.shape_cast %109 : vector<1x1x32xf32> to vector<1x32xf32>
    %111 = vector.broadcast %110 : vector<1x32xf32> to vector<8x32xf32>
    %112 = arith.addf %108, %111 : vector<8x32xf32>
    %c2_66 = arith.constant 2 : index
    %c0_67 = arith.constant 0 : index
    %c0_68 = arith.constant 0 : index
    %113 = vector.load %arg9[%c2_66, %c0_67, %c0_68] : memref<3x32x32xf32, #tpu.memory_space<vmem>>, vector<1x32x32xf32>
    %114 = vector.shape_cast %113 : vector<1x32x32xf32> to vector<32x32xf32>
    %cst_69 = arith.constant dense<0.000000e+00> : vector<8x32xf32>
    %115 = tpu.matmul %61, %114, %cst_69 {dimension_numbers = #tpu.dot_dimension_numbers<[1], [0], [0], [1], [0, 0, 1, 1], [], []>} : vector<8x32xf32>, vector<32x32xf32>, vector<8x32xf32> -> vector<8x32xf32>
    %c2_70 = arith.constant 2 : index
    %c0_71 = arith.constant 0 : index
    %c0_72 = arith.constant 0 : index
    %116 = vector.load %arg11[%c2_70, %c0_71, %c0_72] : memref<3x1x32xf32, #tpu.memory_space<vmem>>, vector<1x1x32xf32>
    %117 = vector.shape_cast %116 : vector<1x1x32xf32> to vector<1x32xf32>
    %118 = vector.broadcast %117 : vector<1x32xf32> to vector<8x32xf32>
    %119 = arith.addf %115, %118 : vector<8x32xf32>
    %120 = arith.mulf %85, %119 : vector<8x32xf32>
    %121 = arith.addf %112, %120 : vector<8x32xf32>
    %122 = math.tanh %121 : vector<8x32xf32>
    %cst_73 = arith.constant 1.000000e+00 : f32
    %123 = vector.broadcast %cst_73 : f32 to vector<8x32xf32>
    %124 = arith.subf %123, %105 : vector<8x32xf32>
    %125 = arith.mulf %124, %122 : vector<8x32xf32>
    %126 = arith.mulf %105, %61 : vector<8x32xf32>
    %127 = arith.addf %125, %126 : vector<8x32xf32>
    %c1_74 = arith.constant 1 : index
    %c0_75 = arith.constant 0 : index
    %c0_76 = arith.constant 0 : index
    %128 = vector.load %arg7[%c1_74, %c0_75, %c0_76] : memref<2x32x32xf32, #tpu.memory_space<vmem>>, vector<1x32x32xf32>
    %129 = vector.shape_cast %128 : vector<1x32x32xf32> to vector<32x32xf32>
    %cst_77 = arith.constant dense<0.000000e+00> : vector<8x32xf32>
    %130 = tpu.matmul %127, %129, %cst_77 {dimension_numbers = #tpu.dot_dimension_numbers<[1], [0], [0], [1], [0, 0, 1, 1], [], []>} : vector<8x32xf32>, vector<32x32xf32>, vector<8x32xf32> -> vector<8x32xf32>
    %cst_78 = arith.constant dense<0.000000e+00> : vector<8x32xf32>
    %131 = tpu.matmul %20, %130, %cst_78 {dimension_numbers = #tpu.dot_dimension_numbers<[1], [0], [0], [1], [0, 0, 1, 1], [], []>} : vector<8x8xf32>, vector<8x32xf32>, vector<8x32xf32> -> vector<8x32xf32>
    %c0_79 = arith.constant 0 : index
    %c0_80 = arith.constant 0 : index
    %c0_81 = arith.constant 0 : index
    %132 = vector.load %arg8[%c0_79, %c0_80, %c0_81] : memref<3x32x32xf32, #tpu.memory_space<vmem>>, vector<1x32x32xf32>
    %133 = vector.shape_cast %132 : vector<1x32x32xf32> to vector<32x32xf32>
    %cst_82 = arith.constant dense<0.000000e+00> : vector<8x32xf32>
    %134 = tpu.matmul %131, %133, %cst_82 {dimension_numbers = #tpu.dot_dimension_numbers<[1], [0], [0], [1], [0, 0, 1, 1], [], []>} : vector<8x32xf32>, vector<32x32xf32>, vector<8x32xf32> -> vector<8x32xf32>
    %c0_83 = arith.constant 0 : index
    %c0_84 = arith.constant 0 : index
    %c0_85 = arith.constant 0 : index
    %135 = vector.load %arg10[%c0_83, %c0_84, %c0_85] : memref<3x1x32xf32, #tpu.memory_space<vmem>>, vector<1x1x32xf32>
    %136 = vector.shape_cast %135 : vector<1x1x32xf32> to vector<1x32xf32>
    %137 = vector.broadcast %136 : vector<1x32xf32> to vector<8x32xf32>
    %138 = arith.addf %134, %137 : vector<8x32xf32>
    %c0_86 = arith.constant 0 : index
    %c0_87 = arith.constant 0 : index
    %c0_88 = arith.constant 0 : index
    %139 = vector.load %arg9[%c0_86, %c0_87, %c0_88] : memref<3x32x32xf32, #tpu.memory_space<vmem>>, vector<1x32x32xf32>
    %140 = vector.shape_cast %139 : vector<1x32x32xf32> to vector<32x32xf32>
    %cst_89 = arith.constant dense<0.000000e+00> : vector<8x32xf32>
    %141 = tpu.matmul %127, %140, %cst_89 {dimension_numbers = #tpu.dot_dimension_numbers<[1], [0], [0], [1], [0, 0, 1, 1], [], []>} : vector<8x32xf32>, vector<32x32xf32>, vector<8x32xf32> -> vector<8x32xf32>
    %142 = arith.addf %138, %141 : vector<8x32xf32>
    %c0_90 = arith.constant 0 : index
    %c0_91 = arith.constant 0 : index
    %c0_92 = arith.constant 0 : index
    %143 = vector.load %arg11[%c0_90, %c0_91, %c0_92] : memref<3x1x32xf32, #tpu.memory_space<vmem>>, vector<1x1x32xf32>
    %144 = vector.shape_cast %143 : vector<1x1x32xf32> to vector<1x32xf32>
    %145 = vector.broadcast %144 : vector<1x32xf32> to vector<8x32xf32>
    %146 = arith.addf %142, %145 : vector<8x32xf32>
    %147 = arith.negf %146 : vector<8x32xf32>
    %148 = math.exp %147 : vector<8x32xf32>
    %cst_93 = arith.constant 1.000000e+00 : f32
    %149 = vector.broadcast %cst_93 : f32 to vector<8x32xf32>
    %150 = arith.addf %149, %148 : vector<8x32xf32>
    %151 = arith.divf %149, %150 : vector<8x32xf32>
    %c1_94 = arith.constant 1 : index
    %c0_95 = arith.constant 0 : index
    %c0_96 = arith.constant 0 : index
    %152 = vector.load %arg8[%c1_94, %c0_95, %c0_96] : memref<3x32x32xf32, #tpu.memory_space<vmem>>, vector<1x32x32xf32>
    %153 = vector.shape_cast %152 : vector<1x32x32xf32> to vector<32x32xf32>
    %cst_97 = arith.constant dense<0.000000e+00> : vector<8x32xf32>
    %154 = tpu.matmul %131, %153, %cst_97 {dimension_numbers = #tpu.dot_dimension_numbers<[1], [0], [0], [1], [0, 0, 1, 1], [], []>} : vector<8x32xf32>, vector<32x32xf32>, vector<8x32xf32> -> vector<8x32xf32>
    %c1_98 = arith.constant 1 : index
    %c0_99 = arith.constant 0 : index
    %c0_100 = arith.constant 0 : index
    %155 = vector.load %arg10[%c1_98, %c0_99, %c0_100] : memref<3x1x32xf32, #tpu.memory_space<vmem>>, vector<1x1x32xf32>
    %156 = vector.shape_cast %155 : vector<1x1x32xf32> to vector<1x32xf32>
    %157 = vector.broadcast %156 : vector<1x32xf32> to vector<8x32xf32>
    %158 = arith.addf %154, %157 : vector<8x32xf32>
    %c1_101 = arith.constant 1 : index
    %c0_102 = arith.constant 0 : index
    %c0_103 = arith.constant 0 : index
    %159 = vector.load %arg9[%c1_101, %c0_102, %c0_103] : memref<3x32x32xf32, #tpu.memory_space<vmem>>, vector<1x32x32xf32>
    %160 = vector.shape_cast %159 : vector<1x32x32xf32> to vector<32x32xf32>
    %cst_104 = arith.constant dense<0.000000e+00> : vector<8x32xf32>
    %161 = tpu.matmul %127, %160, %cst_104 {dimension_numbers = #tpu.dot_dimension_numbers<[1], [0], [0], [1], [0, 0, 1, 1], [], []>} : vector<8x32xf32>, vector<32x32xf32>, vector<8x32xf32> -> vector<8x32xf32>
    %162 = arith.addf %158, %161 : vector<8x32xf32>
    %c1_105 = arith.constant 1 : index
    %c0_106 = arith.constant 0 : index
    %c0_107 = arith.constant 0 : index
    %163 = vector.load %arg11[%c1_105, %c0_106, %c0_107] : memref<3x1x32xf32, #tpu.memory_space<vmem>>, vector<1x1x32xf32>
    %164 = vector.shape_cast %163 : vector<1x1x32xf32> to vector<1x32xf32>
    %165 = vector.broadcast %164 : vector<1x32xf32> to vector<8x32xf32>
    %166 = arith.addf %162, %165 : vector<8x32xf32>
    %167 = arith.negf %166 : vector<8x32xf32>
    %168 = math.exp %167 : vector<8x32xf32>
    %cst_108 = arith.constant 1.000000e+00 : f32
    %169 = vector.broadcast %cst_108 : f32 to vector<8x32xf32>
    %170 = arith.addf %169, %168 : vector<8x32xf32>
    %171 = arith.divf %169, %170 : vector<8x32xf32>
    %c2_109 = arith.constant 2 : index
    %c0_110 = arith.constant 0 : index
    %c0_111 = arith.constant 0 : index
    %172 = vector.load %arg8[%c2_109, %c0_110, %c0_111] : memref<3x32x32xf32, #tpu.memory_space<vmem>>, vector<1x32x32xf32>
    %173 = vector.shape_cast %172 : vector<1x32x32xf32> to vector<32x32xf32>
    %cst_112 = arith.constant dense<0.000000e+00> : vector<8x32xf32>
    %174 = tpu.matmul %131, %173, %cst_112 {dimension_numbers = #tpu.dot_dimension_numbers<[1], [0], [0], [1], [0, 0, 1, 1], [], []>} : vector<8x32xf32>, vector<32x32xf32>, vector<8x32xf32> -> vector<8x32xf32>
    %c2_113 = arith.constant 2 : index
    %c0_114 = arith.constant 0 : index
    %c0_115 = arith.constant 0 : index
    %175 = vector.load %arg10[%c2_113, %c0_114, %c0_115] : memref<3x1x32xf32, #tpu.memory_space<vmem>>, vector<1x1x32xf32>
    %176 = vector.shape_cast %175 : vector<1x1x32xf32> to vector<1x32xf32>
    %177 = vector.broadcast %176 : vector<1x32xf32> to vector<8x32xf32>
    %178 = arith.addf %174, %177 : vector<8x32xf32>
    %c2_116 = arith.constant 2 : index
    %c0_117 = arith.constant 0 : index
    %c0_118 = arith.constant 0 : index
    %179 = vector.load %arg9[%c2_116, %c0_117, %c0_118] : memref<3x32x32xf32, #tpu.memory_space<vmem>>, vector<1x32x32xf32>
    %180 = vector.shape_cast %179 : vector<1x32x32xf32> to vector<32x32xf32>
    %cst_119 = arith.constant dense<0.000000e+00> : vector<8x32xf32>
    %181 = tpu.matmul %127, %180, %cst_119 {dimension_numbers = #tpu.dot_dimension_numbers<[1], [0], [0], [1], [0, 0, 1, 1], [], []>} : vector<8x32xf32>, vector<32x32xf32>, vector<8x32xf32> -> vector<8x32xf32>
    %c2_120 = arith.constant 2 : index
    %c0_121 = arith.constant 0 : index
    %c0_122 = arith.constant 0 : index
    %182 = vector.load %arg11[%c2_120, %c0_121, %c0_122] : memref<3x1x32xf32, #tpu.memory_space<vmem>>, vector<1x1x32xf32>
    %183 = vector.shape_cast %182 : vector<1x1x32xf32> to vector<1x32xf32>
    %184 = vector.broadcast %183 : vector<1x32xf32> to vector<8x32xf32>
    %185 = arith.addf %181, %184 : vector<8x32xf32>
    %186 = arith.mulf %151, %185 : vector<8x32xf32>
    %187 = arith.addf %178, %186 : vector<8x32xf32>
    %188 = math.tanh %187 : vector<8x32xf32>
    %cst_123 = arith.constant 1.000000e+00 : f32
    %189 = vector.broadcast %cst_123 : f32 to vector<8x32xf32>
    %190 = arith.subf %189, %171 : vector<8x32xf32>
    %191 = arith.mulf %190, %188 : vector<8x32xf32>
    %192 = arith.mulf %171, %127 : vector<8x32xf32>
    %193 = arith.addf %191, %192 : vector<8x32xf32>
    %cst_124 = arith.constant 0.000000e+00 : f32
    %194 = vector.broadcast %cst_124 : f32 to vector<8x32xf32>
    %195 = arith.maximumf %193, %194 : vector<8x32xf32>
    %c0_125 = arith.constant 0 : index
    %c0_126 = arith.constant 0 : index
    %196 = vector.load %arg21[%c0_125, %c0_126] : memref<8x32xf32, #tpu.memory_space<vmem>>, vector<8x32xf32>
    tpu.vector_store %arg21[%c0_125, %c0_126], %195 {strides = array<i32>} : memref<8x32xf32, #tpu.memory_space<vmem>>, vector<8x32xf32>,
    %197 = vector.extract_strided_slice %0 {offsets = [0, 0], sizes = [1, 32], strides = [1, 1]} : vector<64x32xf32> to vector<1x32xf32>
    %c0_127 = arith.constant 0 : index
    %c0_128 = arith.constant 0 : index
    %198 = vector.load %arg22[%c0_127, %c0_128] : memref<1x32xf32, #tpu.memory_space<vmem>>, vector<1x32xf32>
    tpu.vector_store %arg22[%c0_127, %c0_128], %197 {strides = array<i32>} : memref<1x32xf32, #tpu.memory_space<vmem>>, vector<1x32xf32>,
    %c0_129 = arith.constant 0 : index
    %c0_130 = arith.constant 0 : index
    %199 = vector.load %arg12[%c0_129, %c0_130] : memref<16x1xi32, #tpu.memory_space<vmem>>, vector<16x1xi32>
    %200 = tpu.iota {dimensions = array<i32: 1>} : vector<16x64xi32>
    %201 = vector.broadcast %199 : vector<16x1xi32> to vector<16x64xi32>
    %202 = arith.cmpi eq, %201, %200 : vector<16x64xi32>
    %203 = arith.extui %202 : vector<16x64xi1> to vector<16x64xi32>
    %204 = arith.sitofp %203 : vector<16x64xi32> to vector<16x64xf32>
    %cst_131 = arith.constant dense<0.000000e+00> : vector<16x32xf32>
    %205 = tpu.matmul %204, %0, %cst_131 {dimension_numbers = #tpu.dot_dimension_numbers<[1], [0], [0], [1], [0, 0, 1, 1], [], []>} : vector<16x64xf32>, vector<64x32xf32>, vector<16x32xf32> -> vector<16x32xf32>
    %c0_132 = arith.constant 0 : index
    %c0_133 = arith.constant 0 : index
    %206 = vector.load %arg13[%c0_132, %c0_133] : memref<16x1xi32, #tpu.memory_space<vmem>>, vector<16x1xi32>
    %207 = tpu.iota {dimensions = array<i32: 1>} : vector<16x16xi32>
    %208 = vector.broadcast %206 : vector<16x1xi32> to vector<16x16xi32>
    %209 = arith.cmpi eq, %208, %207 : vector<16x16xi32>
    %210 = arith.extui %209 : vector<16x16xi1> to vector<16x16xi32>
    %211 = arith.sitofp %210 : vector<16x16xi32> to vector<16x16xf32>
    %212 = tpu.iota {dimensions = array<i32: 0>} : vector<16x16xi32>
    %c0_134 = arith.constant 0 : index
    %c0_135 = arith.constant 0 : index
    %213 = vector.load %arg14[%c0_134, %c0_135] : memref<1x16xi32, #tpu.memory_space<vmem>>, vector<1x16xi32>
    %214 = vector.broadcast %213 : vector<1x16xi32> to vector<16x16xi32>
    %215 = arith.cmpi eq, %212, %214 : vector<16x16xi32>
    %216 = arith.extui %215 : vector<16x16xi1> to vector<16x16xi32>
    %217 = arith.sitofp %216 : vector<16x16xi32> to vector<16x16xf32>
    %cst_136 = arith.constant dense<0.000000e+00> : vector<16x16xf32>
    %218 = tpu.matmul %217, %211, %cst_136 {dimension_numbers = #tpu.dot_dimension_numbers<[1], [0], [0], [1], [0, 0, 1, 1], [], []>} : vector<16x16xf32>, vector<16x16xf32>, vector<16x16xf32> -> vector<16x16xf32>
    %219 = tpu.iota {dimensions = array<i32: 0>} : vector<16x16xi32>
    %220 = tpu.iota {dimensions = array<i32: 1>} : vector<16x16xi32>
    %221 = arith.cmpi eq, %219, %220 : vector<16x16xi32>
    %cst_137 = arith.constant 1.000000e+00 : f32
    %222 = vector.broadcast %cst_137 : f32 to vector<16x16xf32>
    %223 = arith.select %221, %222, %218 : vector<16x16xi1>, vector<16x16xf32>
    %c0_138 = arith.constant 0 : index
    %c0_139 = arith.constant 0 : index
    %224 = vector.load %arg15[%c0_138, %c0_139] : memref<32x33xf32, #tpu.memory_space<vmem>>, vector<32x33xf32>
    %cst_140 = arith.constant dense<0.000000e+00> : vector<16x33xf32>
    %225 = tpu.matmul %205, %224, %cst_140 {dimension_numbers = #tpu.dot_dimension_numbers<[1], [0], [0], [1], [0, 0, 1, 1], [], []>} : vector<16x32xf32>, vector<32x33xf32>, vector<16x33xf32> -> vector<16x33xf32>
    %226 = vector.extract_strided_slice %225 {offsets = [0, 0], sizes = [16, 32], strides = [1, 1]} : vector<16x33xf32> to vector<16x32xf32>
    %227 = vector.extract_strided_slice %225 {offsets = [0, 32], sizes = [16, 1], strides = [1, 1]} : vector<16x33xf32> to vector<16x1xf32>
    %c0_141 = arith.constant 0 : index
    %c0_142 = arith.constant 0 : index
    %228 = vector.load %arg16[%c0_141, %c0_142] : memref<1x32xf32, #tpu.memory_space<vmem>>, vector<1x32xf32>
    %cst_143 = arith.constant dense<0.000000e+00> : vector<1x16xf32>
    %229 = tpu.matmul %228, %205, %cst_143 {dimension_numbers = #tpu.dot_dimension_numbers<[1], [1], [0], [0], [0, 0, 1, 0], [], []>} : vector<1x32xf32>, vector<16x32xf32>, vector<1x16xf32> -> vector<1x16xf32>
    %230 = vector.broadcast %227 : vector<16x1xf32> to vector<16x16xf32>
    %231 = vector.broadcast %229 : vector<1x16xf32> to vector<16x16xf32>
    %232 = arith.addf %230, %231 : vector<16x16xf32>
    %cst_144 = arith.constant 0.000000e+00 : f32
    %233 = vector.broadcast %cst_144 : f32 to vector<16x16xf32>
    %234 = arith.cmpf ogt, %232, %233 : vector<16x16xf32>
    %cst_145 = arith.constant 2.000000e-01 : f32
    %235 = vector.broadcast %cst_145 : f32 to vector<16x16xf32>
    %236 = arith.mulf %235, %232 : vector<16x16xf32>
    %237 = arith.select %234, %232, %236 : vector<16x16xi1>, vector<16x16xf32>
    %cst_146 = arith.constant 0.000000e+00 : f32
    %238 = vector.broadcast %cst_146 : f32 to vector<16x16xf32>
    %239 = arith.cmpf ogt, %223, %238 : vector<16x16xf32>
    %cst_147 = arith.constant -1.000000e+30 : f32
    %240 = vector.broadcast %cst_147 : f32 to vector<16x16xf32>
    %241 = arith.select %239, %237, %240 : vector<16x16xi1>, vector<16x16xf32>
    %cst_148 = arith.constant dense<0xFF800000> : vector<16xf32>
    %242 = vector.multi_reduction <maximumf>, %241, %cst_148 [1] : vector<16x16xf32> to vector<16xf32>
    %243 = vector.shape_cast %242 : vector<16xf32> to vector<16x1xf32>
    %244 = vector.broadcast %243 : vector<16x1xf32> to vector<16x16xf32>
    %245 = arith.subf %241, %244 : vector<16x16xf32>
    %246 = math.exp %245 : vector<16x16xf32>
    %247 = arith.mulf %223, %246 : vector<16x16xf32>
    %cst_149 = arith.constant dense<0.000000e+00> : vector<16xf32>
    %248 = vector.multi_reduction <add>, %247, %cst_149 [1] : vector<16x16xf32> to vector<16xf32>
    %249 = vector.shape_cast %248 : vector<16xf32> to vector<16x1xf32>
    %cst_150 = arith.constant 1.000000e-16 : f32
    %250 = vector.broadcast %cst_150 : f32 to vector<16x1xf32>
    %251 = arith.addf %249, %250 : vector<16x1xf32>
    %252 = vector.broadcast %251 : vector<16x1xf32> to vector<16x16xf32>
    %253 = arith.divf %247, %252 : vector<16x16xf32>
    %cst_151 = arith.constant dense<0.000000e+00> : vector<16x32xf32>
    %254 = tpu.matmul %253, %226, %cst_151 {dimension_numbers = #tpu.dot_dimension_numbers<[1], [0], [0], [1], [0, 0, 1, 1], [], []>} : vector<16x16xf32>, vector<16x32xf32>, vector<16x32xf32> -> vector<16x32xf32>
    %c0_152 = arith.constant 0 : index
    %c0_153 = arith.constant 0 : index
    %255 = vector.load %arg17[%c0_152, %c0_153] : memref<1x32xf32, #tpu.memory_space<vmem>>, vector<1x32xf32>
    %256 = vector.broadcast %255 : vector<1x32xf32> to vector<16x32xf32>
    %257 = arith.addf %254, %256 : vector<16x32xf32>
    %cst_154 = arith.constant dense<0.000000e+00> : vector<16xf32>
    %258 = vector.multi_reduction <add>, %218, %cst_154 [1] : vector<16x16xf32> to vector<16xf32>
    %259 = vector.shape_cast %258 : vector<16xf32> to vector<16x1xf32>
    %cst_155 = arith.constant 1.000000e+00 : f32
    %260 = vector.broadcast %cst_155 : f32 to vector<16x1xf32>
    %261 = arith.maximumf %259, %260 : vector<16x1xf32>
    %262 = vector.broadcast %261 : vector<16x1xf32> to vector<16x16xf32>
    %263 = arith.divf %218, %262 : vector<16x16xf32>
    %cst_156 = arith.constant dense<0.000000e+00> : vector<16x32xf32>
    %264 = tpu.matmul %263, %257, %cst_156 {dimension_numbers = #tpu.dot_dimension_numbers<[1], [0], [0], [1], [0, 0, 1, 1], [], []>} : vector<16x16xf32>, vector<16x32xf32>, vector<16x32xf32> -> vector<16x32xf32>
    %c0_157 = arith.constant 0 : index
    %c0_158 = arith.constant 0 : index
    %265 = vector.load %arg18[%c0_157, %c0_158] : memref<32x32xf32, #tpu.memory_space<vmem>>, vector<32x32xf32>
    %cst_159 = arith.constant dense<0.000000e+00> : vector<16x32xf32>
    %266 = tpu.matmul %264, %265, %cst_159 {dimension_numbers = #tpu.dot_dimension_numbers<[1], [0], [0], [1], [0, 0, 1, 1], [], []>} : vector<16x32xf32>, vector<32x32xf32>, vector<16x32xf32> -> vector<16x32xf32>
    %c0_160 = arith.constant 0 : index
    %c0_161 = arith.constant 0 : index
    %267 = vector.load %arg19[%c0_160, %c0_161] : memref<1x32xf32, #tpu.memory_space<vmem>>, vector<1x32xf32>
    %268 = vector.broadcast %267 : vector<1x32xf32> to vector<16x32xf32>
    %269 = arith.addf %266, %268 : vector<16x32xf32>
    %c0_162 = arith.constant 0 : index
    %c0_163 = arith.constant 0 : index
    %270 = vector.load %arg20[%c0_162, %c0_163] : memref<32x32xf32, #tpu.memory_space<vmem>>, vector<32x32xf32>
    %cst_164 = arith.constant dense<0.000000e+00> : vector<16x32xf32>
    %271 = tpu.matmul %257, %270, %cst_164 {dimension_numbers = #tpu.dot_dimension_numbers<[1], [0], [0], [1], [0, 0, 1, 1], [], []>} : vector<16x32xf32>, vector<32x32xf32>, vector<16x32xf32> -> vector<16x32xf32>
    %272 = arith.addf %269, %271 : vector<16x32xf32>
    %273 = arith.mulf %272, %272 : vector<16x32xf32>
    %cst_165 = arith.constant dense<0.000000e+00> : vector<16xf32>
    %274 = vector.multi_reduction <add>, %273, %cst_165 [1] : vector<16x32xf32> to vector<16xf32>
    %275 = vector.shape_cast %274 : vector<16xf32> to vector<16x1xf32>
    %276 = math.sqrt %275 : vector<16x1xf32>
    %cst_166 = arith.constant 9.99999996E-13 : f32
    %277 = vector.broadcast %cst_166 : f32 to vector<16x1xf32>
    %278 = arith.maximumf %276, %277 : vector<16x1xf32>
    %279 = vector.broadcast %278 : vector<16x1xf32> to vector<16x32xf32>
    %280 = arith.divf %272, %279 : vector<16x32xf32>
    %281 = vector.extract_strided_slice %280 {offsets = [0, 0], sizes = [8, 32], strides = [1, 1]} : vector<16x32xf32> to vector<8x32xf32>
    %c0_167 = arith.constant 0 : index
    %c0_168 = arith.constant 0 : index
    %282 = vector.load %arg23[%c0_167, %c0_168] : memref<8x32xf32, #tpu.memory_space<vmem>>, vector<8x32xf32>
    tpu.vector_store %arg23[%c0_167, %c0_168], %281 {strides = array<i32>} : memref<8x32xf32, #tpu.memory_space<vmem>>, vector<8x32xf32>,
    return
  }
}

</mosaic_0001>

<bundles_post_ra>
// kernel: tpu_custom_call.1
= control target key start
LH: loop header
LB: loop body
LE: loop exit
PB: predicated region body
PF: predicated region fallthrough
CT: control target
= control target key end

     0   :  { %s4461_s0 = inlined_call_operand.vmem [shape: f32[64,32], index: 0, kind: input, shape index: {}]   ;;  %s4462_s1 = inlined_call_operand.vmem [shape: s32[8,1], index: 1, kind: input, shape index: {}]   ;;  %s4463_s2 = inlined_call_operand.vmem [shape: s32[8,1], index: 2, kind: input, shape index: {}]   ;;  %s4464_s3 = inlined_call_operand.vmem [shape: s32[1,8], index: 3, kind: input, shape index: {}]   ;;  %s4465_s4 = inlined_call_operand.hbm [shape: f32[32,33], index: 4, kind: input, shape index: {}]   ;;  %s4466_s5 = inlined_call_operand.hbm [shape: f32[1,32], index: 5, kind: input, shape index: {}]   ;;  %s4467_s6 = inlined_call_operand.hbm [shape: f32[1,32], index: 6, kind: input, shape index: {}]   ;;  %s4468_s7 = inlined_call_operand.vmem [shape: f32[2,32,32], index: 7, kind: input, shape index: {}]   ;;  %s4469_s8 = inlined_call_operand.vmem [shape: f32[3,32,32], index: 8, kind: input, shape index: {}]   ;;  %s4470_s9 = inlined_call_operand.hbm [shape: f32[3,32,32], index: 9, kind: input, shape index: {}]   ;;  %s4471_s10 = inlined_call_operand.hbm [shape: f32[3,1,32], index: 10, kind: input, shape index: {}]   ;;  %s4472_s11 = inlined_call_operand.hbm [shape: f32[3,1,32], index: 11, kind: input, shape index: {}]   ;;  %s4473_s12 = inlined_call_operand.vmem [shape: s32[16,1], index: 12, kind: input, shape index: {}]   ;;  %s4474_s13 = inlined_call_operand.vmem [shape: s32[16,1], index: 13, kind: input, shape index: {}]   ;;  %s4475_s14 = inlined_call_operand.vmem [shape: s32[1,16], index: 14, kind: input, shape index: {}]   ;;  %s4476_s15 = inlined_call_operand.vmem [shape: f32[32,33], index: 15, kind: input, shape index: {}]   ;;  %s4477_s16 = inlined_call_operand.vmem [shape: f32[1,32], index: 16, kind: input, shape index: {}]   ;;  %s4478_s17 = inlined_call_operand.vmem [shape: f32[1,32], index: 17, kind: input, shape index: {}]   ;;  %s4479_s18 = inlined_call_operand.hbm [shape: f32[32,32], index: 18, kind: input, shape index: {}]   ;;  %s4480_s19 = inlined_call_operand.vmem [shape: f32[1,32], index: 19, kind: input, shape index: {}]   ;;  %s4481_s20 = inlined_call_operand.hbm [shape: f32[32,32], index: 20, kind: input, shape index: {}]   ;;  %s4482_s21 = inlined_call_operand.hbm [shape: f32[8,32], index: 21, kind: output, shape index: {0}]   ;;  %s4483_s22 = inlined_call_operand.hbm [shape: f32[1,32], index: 22, kind: output, shape index: {1}]   ;;  %s4484_s23 = inlined_call_operand.hbm [shape: f32[8,32], index: 23, kind: output, shape index: {2}]  }
   0x1   :  { %4493 = sst [smem:[#allocation27_spill]] %s4461_s0 }
   0x2   :  { %4494 = sst [smem:[#allocation28_spill]] %s4462_s1 }
   0x3   :  { %4495 = sst [smem:[#allocation29_spill]] %s4463_s2 }
   0x4   :  { %4496 = sst [smem:[#allocation30_spill]] %s4464_s3 }
   0x5   :  { %4497 = sst [smem:[#allocation31_spill]] %s4465_s4 }
   0x6   :  { %4498 = sst [smem:[#allocation32_spill]] %s4466_s5 }
   0x7   :  { %4499 = sst [smem:[#allocation33_spill]] %s4467_s6 }
   0x8   :  { %4500 = sst [smem:[#allocation34_spill]] %s4468_s7 }
   0x9   :  { %4501 = sst [smem:[#allocation35_spill]] %s4484_s23 }
   0xa   :  { %29 = vsyncpa [#allocation3], 0 }
   0xb   :  { %30 = vsyncpa [#allocation6], 0 }
   0xc   :  { %31 = vsyncpa [#allocation9], 0 }
   0xd   :  { %32 = vsyncpa [#allocation12], 0 }
   0xe   :  { %33 = vsyncpa [#allocation15], 0 }
   0xf   :  { %34 = vsyncpa [#allocation4], 0 }
  0x10   :  { %35 = vsyncpa [#allocation18], 0  ;;  %s3714_s4 = smov [#allocation5]   ;;  %s4502_s5 = sld [smem:[#allocation32_spill]] }
  0x11   :  { %s62_s30 = sshll.u32 %s3714_s4, 4  ;;  %s63_s30 = int_to_ptr.vmem [resolvable:$true] %s62_s30 }
  0x16   :  { %s3458_s1 = scalar_lea.hbm %s4502_s5, 16 }
  0x17   :  { %p3459_p0 = scmp.ne.s32.totalorder %s4502_s5, %s3458_s1  ;;  %p3462_p1 = scmp.lt.u32.totalorder %s3458_s1, %s4502_s5 }
  0x19   :  { %p3464_p2 = pnand %p3462_p1, %p3459_p0 }
  0x1b   :  { %3467 = shalt.err (!%p3464_p2)
}
  0x1c   :  { %s3468_s7 = scalar_lea.vmem %s63_s30, 16  ;;  %s3472_s28 = scalar_lea.vmem %s63_s30, 32 }
  0x1d   :  { %p3469_p3 = scmp.ne.s32.totalorder %s63_s30, %s3468_s7  ;;  %p3473_p4 = scmp.lt.s32.totalorder %s63_s30, %s63_s30 }
  0x1e   :  { %p3474_p5 = scmp.lt.s32.totalorder %s3472_s28, %s3468_s7 }
  0x20   :  { %p3475_p6 = por %p3474_p5, %p3473_p4 }
  0x22   :  { %p3476_p7 = pnand %p3475_p6, %p3469_p3 }
  0x24   :  { %3479 = shalt.err (!%p3476_p7)
}
  0x25   :  { %65 = dma.hbm_to_vmem [thread:$0]  %s4502_s5, 16, %s63_s30, [#allocation6]  }
  0x26   :  { %s3715_s0 = smov [#allocation8]   ;;  %s3480_s1 = scalar_lea.hbm %s4470_s9, 1536 }
  0x27   :  { %s85_s4 = sshll.u32 %s3715_s0, 4  ;;  %p3481_p8 = scmp.ne.s32.totalorder %s4470_s9, %s3480_s1  ;;  %s86_s4 = int_to_ptr.vmem [resolvable:$true] %s85_s4 }
  0x28   :  { %p3484_p9 = scmp.lt.u32.totalorder %s3480_s1, %s4470_s9 }
  0x2a   :  { %p3486_p10 = pnand %p3484_p9, %p3481_p8 }
  0x2c   :  { %3489 = shalt.err (!%p3486_p10)
}
  0x2d   :  { %s3490_s7 = scalar_lea.vmem %s86_s4, 1536  ;;  %p3495_p12 = scmp.lt.s32.totalorder %s86_s4, %s86_s4 }
  0x2e   :  { %p3491_p11 = scmp.ne.s32.totalorder %s86_s4, %s3490_s7  ;;  %p3496_p13 = scmp.lt.s32.totalorder %s3490_s7, %s3490_s7 }
  0x30   :  { %p3497_p0 = por %p3496_p13, %p3495_p12 }
  0x32   :  { %p3498_p1 = pnand %p3497_p0, %p3491_p11 }
  0x34   :  { %3501 = shalt.err (!%p3498_p1)
}
  0x35   :  { %s3716_s30 = smov 128   ;;  %s3717_s5 = smov 8  }
  0x36   :  { %91 = dma.hbm_to_vmem [thread:$0]  %s4470_s9, 1536, %s86_s4, [#allocation9], %s3716_s30, %s3716_s30, %s3717_s5  }
  0x37   :  { %s3718_s3 = smov [#allocation11]   ;;  %s3719_s24 = smov [#allocation2]  }
  0x38   :  { %s109_s0 = sshll.u32 %s3718_s3, 4  ;;  %s49_s25 = sshll.u32 %s3719_s24, 4  ;;  %s110_s0 = int_to_ptr.vmem [resolvable:$true] %s109_s0  ;;  %s3883_s25 = int_to_ptr.vmem [resolvable:$true] %s49_s25 }
  0x39   :  { %s3502_s2 = scalar_lea.hbm %s4472_s11, 48 }
  0x3a   :  { %p3503_p2 = scmp.ne.s32.totalorder %s4472_s11, %s3502_s2  ;;  %p3506_p3 = scmp.lt.u32.totalorder %s3502_s2, %s4472_s11 }
  0x3c   :  { %p3508_p4 = pnand %p3506_p3, %p3503_p2 }
  0x3e   :  { %3511 = shalt.err (!%p3508_p4)
}
  0x3f   :  { %s3512_s9 = scalar_lea.vmem %s110_s0, 48  ;;  %s3516_s4 = scalar_lea.vmem %s110_s0, 64 }
  0x40   :  { %p3513_p5 = scmp.ne.s32.totalorder %s110_s0, %s3512_s9  ;;  %p3517_p6 = scmp.lt.s32.totalorder %s110_s0, %s110_s0 }
  0x41   :  { %p3518_p7 = scmp.lt.s32.totalorder %s3516_s4, %s3512_s9 }
  0x43   :  { %p3519_p8 = por %p3518_p7, %p3517_p6 }
  0x45   :  { %p3520_p9 = pnand %p3519_p8, %p3513_p5 }
  0x47   :  { %3523 = shalt.err (!%p3520_p9)
}
  0x48   :  { %s4491_s28 = smov 16   ;;  %s4492_s29 = smov 1  }
  0x49   :  { %115 = dma.hbm_to_vmem [thread:$0]  %s4472_s11, 48, %s110_s0, [#allocation12], %s4491_s28, %s4491_s28, %s4492_s29  }
  0x4a   :  { %s4503_s26 = sld [smem:[#allocation31_spill]] }
  0x50   :  { %s3524_s2 = scalar_lea.hbm %s4503_s26, 512 }
  0x51   :  { %p3525_p10 = scmp.ne.s32.totalorder %s4503_s26, %s3524_s2  ;;  %p3528_p11 = scmp.lt.u32.totalorder %s3524_s2, %s4503_s26 }
  0x53   :  { %p3530_p12 = pnand %p3528_p11, %p3525_p10 }
  0x55   :  { %3533 = shalt.err (!%p3530_p12)
}
  0x56   :  { %s3534_s4 = scalar_lea.vmem %s3883_s25, 512  ;;  %p3539_p0 = scmp.lt.s32.totalorder %s3883_s25, %s3883_s25 }
  0x57   :  { %p3535_p13 = scmp.ne.s32.totalorder %s3883_s25, %s3534_s4  ;;  %p3540_p1 = scmp.lt.s32.totalorder %s3534_s4, %s3534_s4 }
  0x59   :  { %p3541_p2 = por %p3540_p1, %p3539_p0 }
  0x5b   :  { %p3542_p3 = pnand %p3541_p2, %p3535_p13 }
  0x5d   :  { %3545 = shalt.err (!%p3542_p3)
}
  0x5e   :  { %55 = dma.hbm_to_vmem [thread:$0]  %s4503_s26, 512, %s3883_s25, [#allocation3], %s3716_s30, %s3716_s30, %s3717_s5  }
  0x5f   :  { %s3722_s3 = smov [#allocation7]   ;;  %s3723_s23 = smov [#allocation10]  }
  0x60   :  { %s72_s24 = sshll.u32 %s3722_s3, 4  ;;  %s97_s1 = sshll.u32 %s3723_s23, 4  ;;  %s73_s24 = int_to_ptr.vmem [resolvable:$true] %s72_s24  ;;  %s3920_s1 = int_to_ptr.vmem [resolvable:$true] %s97_s1 }
  0x61   :  { %s4504_s27 = sld [smem:[#allocation33_spill]] }
  0x67   :  { %s3546_s7 = scalar_lea.hbm %s4504_s27, 16 }
  0x68   :  { %p3547_p4 = scmp.ne.s32.totalorder %s4504_s27, %s3546_s7  ;;  %p3550_p5 = scmp.lt.u32.totalorder %s3546_s7, %s4504_s27 }
  0x6a   :  { %p3552_p6 = pnand %p3550_p5, %p3547_p4 }
  0x6c   :  { %3555 = shalt.err (!%p3552_p6)
}
  0x6d   :  { %s3556_s25 = scalar_lea.vmem %s73_s24, 16  ;;  %s3560_s26 = scalar_lea.vmem %s73_s24, 32 }
  0x6e   :  { %p3557_p7 = scmp.ne.s32.totalorder %s73_s24, %s3556_s25  ;;  %p3561_p8 = scmp.lt.s32.totalorder %s73_s24, %s73_s24 }
  0x6f   :  { %p3562_p9 = scmp.lt.s32.totalorder %s3560_s26, %s3556_s25 }
  0x71   :  { %p3563_p10 = por %p3562_p9, %p3561_p8 }
  0x73   :  { %p3564_p11 = pnand %p3563_p10, %p3557_p7 }
  0x75   :  { %3567 = shalt.err (!%p3564_p11)
}
  0x76   :  { %75 = dma.hbm_to_vmem [thread:$0]  %s4504_s27, 16, %s73_s24, [#allocation6]  }
  0x77   :  { %s3568_s2 = scalar_lea.hbm %s4471_s10, 48 }
  0x78   :  { %p3569_p12 = scmp.ne.s32.totalorder %s4471_s10, %s3568_s2  ;;  %p3572_p13 = scmp.lt.u32.totalorder %s3568_s2, %s4471_s10 }
  0x7a   :  { %p3574_p0 = pnand %p3572_p13, %p3569_p12 }
  0x7c   :  { %3577 = shalt.err (!%p3574_p0)
}
  0x7d   :  { %s3578_s9 = scalar_lea.vmem %s3920_s1, 48  ;;  %s3582_s24 = scalar_lea.vmem %s3920_s1, 64 }
  0x7e   :  { %p3579_p1 = scmp.ne.s32.totalorder %s3920_s1, %s3578_s9  ;;  %p3583_p2 = scmp.lt.s32.totalorder %s3920_s1, %s3920_s1 }
  0x7f   :  { %p3584_p3 = scmp.lt.s32.totalorder %s3582_s24, %s3578_s9 }
  0x81   :  { %p3585_p4 = por %p3584_p3, %p3583_p2 }
  0x83   :  { %p3586_p5 = pnand %p3585_p4, %p3579_p1 }
  0x85   :  { %3589 = shalt.err (!%p3586_p5)
}
  0x86   :  { %s4505_s27 = smov 1   ;;  %s4506_s4 = smov 16  }
  0x87   :  { %103 = dma.hbm_to_vmem [thread:$0]  %s4471_s10, 48, %s3920_s1, [#allocation9], %s4506_s4, %s4506_s4, %s4505_s27  }
  0x88   :  { %s3724_s11 = smov [#allocation13]   ;;  %s3725_s3 = smov [#allocation14]  }
  0x89   :  { %s133_s0 = sshll.u32 %s3724_s11, 4  ;;  %s147_s23 = sshll.u32 %s3725_s3, 4  ;;  %s134_s0 = int_to_ptr.vmem [resolvable:$true] %s133_s0  ;;  %s3955_s23 = int_to_ptr.vmem [resolvable:$true] %s147_s23 }
  0x8a   :  { %s3590_s29 = scalar_lea.hbm %s4479_s18, 512 }
  0x8b   :  { %p3591_p6 = scmp.ne.s32.totalorder %s4479_s18, %s3590_s29  ;;  %p3594_p7 = scmp.lt.u32.totalorder %s3590_s29, %s4479_s18 }
  0x8d   :  { %p3596_p8 = pnand %p3594_p7, %p3591_p6 }
  0x8f   :  { %3599 = shalt.err (!%p3596_p8)
}
  0x90   :  { %s3600_s10 = scalar_lea.vmem %s134_s0, 512  ;;  %p3605_p10 = scmp.lt.s32.totalorder %s134_s0, %s134_s0 }
  0x91   :  { %p3601_p9 = scmp.ne.s32.totalorder %s134_s0, %s3600_s10  ;;  %p3606_p11 = scmp.lt.s32.totalorder %s3600_s10, %s3600_s10 }
  0x93   :  { %p3607_p12 = por %p3606_p11, %p3605_p10 }
  0x95   :  { %p3608_p13 = pnand %p3607_p12, %p3601_p9 }
  0x97   :  { %3611 = shalt.err (!%p3608_p13)
}
  0x98   :  { %139 = dma.hbm_to_vmem [thread:$0]  %s4479_s18, 512, %s134_s0, [#allocation12], %s3716_s30, %s3716_s30, %s3717_s5  }
  0x99   :  { %s3612_s26 = scalar_lea.hbm %s4481_s20, 512 }
  0x9a   :  { %p3613_p0 = scmp.ne.s32.totalorder %s4481_s20, %s3612_s26  ;;  %p3616_p1 = scmp.lt.u32.totalorder %s3612_s26, %s4481_s20 }
  0x9c   :  { %p3618_p2 = pnand %p3616_p1, %p3613_p0 }
  0x9e   :  { %3621 = shalt.err (!%p3618_p2)
}
  0x9f   :  { %s3622_s29 = scalar_lea.vmem %s3955_s23, 512  ;;  %p3627_p4 = scmp.lt.s32.totalorder %s3955_s23, %s3955_s23 }
  0xa0   :  { %p3623_p3 = scmp.ne.s32.totalorder %s3955_s23, %s3622_s29  ;;  %p3628_p5 = scmp.lt.s32.totalorder %s3622_s29, %s3622_s29 }
  0xa2   :  { %p3629_p6 = por %p3628_p5, %p3627_p4 }
  0xa4   :  { %p3630_p7 = pnand %p3629_p6, %p3623_p3 }
  0xa6   :  { %3633 = shalt.err (!%p3630_p7)
}
  0xa7   :  { %153 = dma.hbm_to_vmem [thread:$0]  %s4481_s20, 512, %s3955_s23, [#allocation15], %s3716_s30, %s3716_s30, %s3717_s5  }
  0xa8   :  { %3700 = dma.done.wait [#allocation3], 512  }
  0xa9   :  { %3701 = vsyncadd [#allocation3], 4294966784 }
  0xaa   :  { %3702 = dma.done.wait [#allocation6], 32  }
  0xab   :  { %3703 = vsyncadd [#allocation6], 4294967264 }
  0xac   :  { %3704 = dma.done.wait [#allocation9], 1584  }
  0xad   :  { %3705 = vsyncadd [#allocation9], 4294965712 }
  0xae   :  { %3706 = dma.done.wait [#allocation12], 560  }
  0xaf   :  { %3707 = vsyncadd [#allocation12], 4294966736 }
  0xb0   :  { %3708 = dma.done.wait [#allocation15], 512  }
  0xb1   :  { %3709 = vsyncadd [#allocation15], 4294966784  ;;  %v3726_v0 = vmov 0   ;;  %v3727_v1 = vmov 0.0|0.0   ;;  %v3728_v2 = vmov 0.0   ;;  %s4507_s5 = sld [smem:[#allocation28_spill]]  ;;  %v187_v17 = vlaneseq }
  0xb2   :  { %3413 = vset.pattern.permute.xlu0 %v3726_v0  ;;  %3230 = vmatprep.subr.bf16.mxu0 %v3727_v1  ;;  %s4508_s7 = sld [smem:[#allocation27_spill]]  ;;  %s4509_s11 = sld [smem:[#allocation29_spill]]  ;;  %vm3729_vm0 = vmmov 0   ;;  %v362_v19 = vld [vmem:[#allocation2] sm:$0xff]  ;;  %v363_v20 = vld [vmem:[#allocation2 + $0x8] sm:$0xff]  ;;  %vm195_vm1 = vcmask 523264  }
  0xb3   :  { %2960 = vmatprep.subr.mxu1 %v3728_v2  ;;  %2957 = vmatprep.mubr.msk.f32.mxu0 %vm3729_vm0, %v3728_v2  ;;  %v4048_v18 = vand.u32 127, %v187_v17  ;;  %v3243_v22 = vpack.c.bf16 %v363_v20, %v362_v19  ;;  %v364_v23 = vld [vmem:[#allocation2 + $0x10] sm:$0xff]  ;;  %v365_v24 = vld [vmem:[#allocation2 + $0x18] sm:$0xff]  ;;  %v3730_v28 = vmov 1.0   ;;  %v4059_v29 = vshrl.u32 %v187_v17, 7  ;;  %s4510_s6 = sld [smem:[#allocation30_spill]] }
  0xb4   :  { %2962 = vmatprep.mubr.msk.f32.mxu1 %vm3729_vm0, %v3728_v2  ;;  %v3246_v27 = vpack.c.bf16 %v365_v24, %v364_v23  ;;  %vm286_vm5 = vcmask 64512   ;;  %v3731_v32 = vmov 32   ;;  %vm366_vm6 = vcmask 261120   ;;  %v440_v35 = vld [vmem:[#allocation5] sm:$0x1]  ;;  %v1892_v51 = vld [vmem:[%s4473_s12 + $0x8] sm:$0xff] }
  0xb5   :  { %3414 = vset.pattern.permute.xlu1 %v3731_v32  ;;  %v521_v42 = vsub.s32 0, %v4059_v29  ;;  %vm360_vm7 = vcmp.eq.s32.totalorder %v4059_v29, %v4048_v18  ;;  %v1986_v52 = vld [vmem:[%s4474_s13] sm:$0xff]  ;;  %v1987_v60 = vld [vmem:[%s4474_s13 + $0x8] sm:$0xff]  ;;  %s4511_s3 = sld [smem:[#allocation34_spill]]  ;;  %v859_v23 = vld [vmem:[#allocation8 + $0x10] sm:$0xff]  ;;  %s3733_s29 = smov [#allocation17]  }
  0xb6   :  { %v1891_v59 = vld [vmem:[%s4473_s12] sm:$0xff]  ;;  %s2696_s18 = sshll.u32 %s3733_s29, 4  ;;  %s3734_s0 = smov [#allocation16]   ;;  %s2697_s18 = int_to_ptr.vmem [resolvable:$true] %s2696_s18 }
  0xb7   :  { %v186_v3 = vld [vmem:[%s4507_s5] sm:$0xff]  ;;  %s2686_s20 = sshll.u32 %s3734_s0, 4  ;;  %s3638_s30 = scalar_lea.vmem %s2697_s18, 32  ;;  %s2687_s20 = int_to_ptr.vmem [resolvable:$true] %s2686_s20 }
  0xb8   :  { %v4001_v4 = vld [vmem:[%s4508_s7] sm:$0xff]  ;;  %190 = vperm.xlu0 %3413, %v186_v3   ;;  %v179_v5 = vld [vmem:[%s4508_s7 + $0x8] sm:$0xff]  ;;  %v180_v6 = vld [vmem:[%s4508_s7 + $0x10] sm:$0xff]  ;;  %p3639_p9 = scmp.lt.s32.totalorder %s2697_s18, %s2697_s18 }
  0xb9   :  { %v181_v7 = vld [vmem:[%s4508_s7 + $0x18] sm:$0xff]  ;;  %v269_v8 = vld [vmem:[%s4509_s11] sm:$0xff]  ;;  %v4016_v9 = vpack.c.bf16 %v179_v5, %v4001_v4  ;;  %v183_v12 = vld [vmem:[%s4508_s7 + $0x28] sm:$0xff] }
  0xba   :  { %v4023_v10 = vpack.c.bf16 %v181_v7, %v180_v6  ;;  %v182_v11 = vld [vmem:[%s4508_s7 + $0x20] sm:$0xff]  ;;  %v184_v14 = vld [vmem:[%s4508_s7 + $0x30] sm:$0xff]  ;;  %v185_v15 = vld [vmem:[%s4508_s7 + $0x38] sm:$0xff] }
  0xbb   :  { %3232 = vmatpush3.bf16.msra.mxu0 %v4016_v9  ;;  %v4033_v13 = vpack.c.bf16 %v183_v12, %v182_v11  ;;  %v4043_v16 = vpack.c.bf16 %v185_v15, %v184_v14  ;;  %v2729_v30 = vld [vmem:[%s4510_s6] ss:$0 sm:$0xff]  ;;  %v624_v62 = vld [vmem:[%s4511_s3 + $0x8] sm:$0xff]  ;;  %v625_v7 = vld [vmem:[%s4511_s3 + $0x10] sm:$0xff] }
  0xbc   :  { %271 = vperm.xlu0 %3413, %v269_v8   ;;  %3233 = vmatprep.subr.bf16.mxu0 %v3727_v1  ;;  %vm283_vm4 = vcmp.eq.s32.totalorder %v4059_v29, %v2729_v30  ;;  %v623_v61 = vld [vmem:[%s4511_s3] sm:$0xff]  ;;  %v626_v8 = vld [vmem:[%s4511_s3 + $0x18] sm:$0xff]  ;;  %v858_v15 = vld [vmem:[#allocation8 + $0x8] sm:$0xff] }
  0xbd   :  { %v2730_v31 = vsel %vm283_vm4, 1.0, %v3728_v2  ;;  %v3249_v63 = vpack.c.bf16 %v624_v62, %v623_v61  ;;  %v3252_v11 = vpack.c.bf16 %v626_v8, %v625_v7  ;;  %v2736_v12 = vld [vmem:[#allocation7] ss:$0 sm:$0xff]  ;;  %v857_v14 = vld [vmem:[#allocation8] sm:$0xff]  ;;  %v1032_v30 = vld [vmem:[#allocation8 + $0x30] sm:$0xff] }
  0xbe   :  { %v860_v24 = vld [vmem:[#allocation8 + $0x18] sm:$0xff] }
  0xbf   :  { %3235 = vmatpush3.bf16.msra.mxu0 %v4023_v10  ;;  %v2762_v8 = vld [vmem:[%s4511_s3 + $0x20] sm:$0xff] }
  0xc0   :  { %3236 = vmatprep.subr.bf16.mxu0 %v3727_v1 }
  0xc3   :  { %3238 = vmatpush3.bf16.msra.mxu0 %v4033_v13 }
  0xc4   :  { %3239 = vmatprep.subr.bf16.mxu0 %v3727_v1 }
  0xc7   :  { %3241 = vmatpush3.bf16.msra.mxu0 %v4043_v16 }
  0xc8   :  { %3242 = vmatprep.subr.bf16.mxu0 %v3727_v1 }
 0x137   :  { %v191_v21 = vpop.permute.xlu0 %190 }
 0x138   :  { %vm192_vm2 = vcmp.eq.s32.totalorder %v191_v21, %v4048_v18  ;;  %v4121_v21 = vpack.c.bf16 %v858_v15, %v857_v14  ;;  %v2765_v15 = vld [vmem:[%s4511_s3 + $0x38] sm:$0xff] }
 0x139   :  { %v2726_v25 = vsel %vm192_vm2, 1.0, %v3728_v2  ;;  %vm2012_vm2 = vcmask 130048  }
 0x13a   :  { %2958 = vmatmul.mubr.msk.f32.vlgmr.msra.gmra.mrb[0].mxu0 %vm195_vm1, %v2726_v25  ;;  %v4128_v25 = vpack.c.bf16 %v860_v24, %v859_v23 }
 0x13b   :  { %v272_v26 = vpop.permute.xlu0 %271  ;;  %3244 = vmatpush3.bf16.msra.mxu0 %v3243_v22  ;;  %2973 = vmatprep.mubr.msk.f32.mxu0 %vm3729_vm0, %v3728_v2 }
 0x13c   :  { %vm273_vm3 = vcmp.eq.s32.totalorder %v272_v26, %v4048_v18  ;;  %3245 = vmatprep.subr.bf16.mxu0 %v3727_v1  ;;  %v1030_v26 = vld [vmem:[#allocation8 + $0x20] sm:$0xff] }
 0x13d   :  { %2961 = vmatpush3.msk.msra.mxu1 %vm273_vm3, %v3730_v28  ;;  %vm3362_vm3 = vmpackc.low %vm366_vm6, %vm366_vm6 }
 0x13e   :  { %2976 = vmatprep.subr.mxu1 %v3728_v2  ;;  %2963 = vmatmul.mubr.msk.f32.vlgmr.msra.gmra.mrb[0].mxu1 %vm286_vm5, %v2730_v31  ;;  %v1033_v31 = vld [vmem:[#allocation8 + $0x38] sm:$0xff] }
 0x13f   :  { %3247 = vmatpush3.bf16.msra.mxu0 %v3246_v27  ;;  %2978 = vmatprep.mubr.msk.f32.mxu1 %vm3729_vm0, %v3728_v2  ;;  %v1031_v27 = vld [vmem:[#allocation8 + $0x28] sm:$0xff] }
 0x140   :  { %3248 = vmatprep.subr.bf16.mxu0 %v3727_v1  ;;  %v4134_v28 = vpack.c.bf16 %v1031_v27, %v1030_v26  ;;  %v4256_v26 = vld [vmem:[#allocation11] ss:$0 sm:$0xff] }
 0x20d   :  { %v265_v33 = vpop.f32.mrb[0].mxu0 }
 0x20e   :  { %v2959_v34 = vpop.f32.mrb[1].mxu0  ;;  %2974 = vmatmul.mubr.msk.f32.vlgmr.msra.gmra.mrb[2].mxu0 %vm366_vm6, %v265_v33  ;;  %2977 = vmatpush3.xpose.msk.msra.mxu1 %vm366_vm6, %v265_v33  ;;  %v1204_v33 = vld [vmem:[#allocation8 + $0x40] sm:$0xff] }
 0x20f   :  { %2981 = vmatprep.subr.mxu1 %v3728_v2  ;;  %2994 = vmatprep.mubr.msk.f32.mxu0 %vm3729_vm0, %v3728_v2  ;;  %v1205_v34 = vld [vmem:[#allocation8 + $0x48] sm:$0xff] }
 0x210   :  { %3250 = vmatpush3.bf16.msra.mxu0 %v3249_v63  ;;  %v2754_v63 = vld [vmem:[%s4469_s8 + $0x40] sm:$0xff] }
 0x211   :  { %2979 = vmatmul.mubr.msk.f32.vlgmr.msra.gmra.mrb[2].mxu1 %vm366_vm6, %v440_v35  ;;  %v4077_v36 = vpop.f32.mrb[0].mxu1  ;;  %3251 = vmatprep.subr.bf16.mxu0 %v3727_v1  ;;  %v4146_v35 = vpack.c.bf16 %v1205_v34, %v1204_v33 }
 0x212   :  { %2983 = vmatprep.mubr.msk.f32.mxu1 %vm3729_vm0, %v3728_v2  ;;  %v2964_v37 = vpop.f32.mrb[1].mxu1  ;;  %v361_v46 = vsel %vm360_vm7, 1.0, %v4077_v36 }
 0x213   :  { %vm527_vm9 = vcmp.gt.f32.partialorder %v361_v46, 0.0  ;;  %v1206_v37 = vld [vmem:[#allocation8 + $0x50] sm:$0xff] }
 0x214   :  { %3253 = vmatpush3.bf16.msra.mxu0 %v3252_v11  ;;  %v2763_v11 = vld [vmem:[%s4511_s3 + $0x28] sm:$0xff] }
 0x215   :  { %3260 = vmatprep.subr.bf16.mxu0 %v3727_v1  ;;  %v3291_v14 = vpack.c.bf16 %v2763_v11, %v2762_v8 }
 0x2e1   :  { %v436_v38 = vpop.f32.mrb[2].mxu0 }
 0x2e2   :  { %516 = vperm.xlu1 %3414, %v436_v38   ;;  %v2975_v39 = vpop.f32.mrb[3].mxu0  ;;  %2982 = vmatpush3.msra.mxu1 %v436_v38  ;;  %v1207_v38 = vld [vmem:[#allocation8 + $0x58] sm:$0xff] }
 0x2e3   :  { %2997 = vmatprep.subr.mxu1 %v3728_v2  ;;  %v4152_v39 = vpack.c.bf16 %v1207_v38, %v1206_v37 }
 0x2e4   :  { %v510_v40 = vpop.f32.mrb[2].mxu1 }
 0x2e5   :  { %v2980_v41 = vpop.f32.mrb[3].mxu1  ;;  %v522_v43 = vrot.slane %v510_v40, %v521_v42  ;;  %v773_v40 = vld [vmem:[%s4469_s8] sm:$0xff] }
 0x2e6   :  { %3415 = vset.pattern.permute.xlu1 %v3726_v0  ;;  %v774_v41 = vld [vmem:[%s4469_s8 + $0x8] sm:$0xff] }
 0x361   :  { %v517_v44 = vpop.permute.xlu1 %516 }
 0x362   :  { %v523_v45 = vadd.f32 %v522_v43, %v517_v44  ;;  %v4169_v43 = vpack.c.bf16 %v774_v41, %v773_v40  ;;  %v4262_v40 = vld [vmem:[#allocation11 + $0x1] ss:$0 sm:$0xff] }
 0x364   :  { %v525_v47 = vmul.f32 0.2, %v523_v45  ;;  %vm524_vm8 = vcmp.gt.f32.partialorder %v523_v45, 0.0 }
 0x366   :  { %v526_v48 = vsel %vm524_vm8, %v523_v45, %v525_v47  ;;  %v775_v45 = vld [vmem:[%s4469_s8 + $0x10] sm:$0xff] }
 0x367   :  { %v528_v49 = vsel %vm527_vm9, %v526_v48, -1e+30 }
 0x368   :  { %v529_v50 = vsel %vm286_vm5, %v528_v49, -inf }
 0x369   :  { %530 = vmax.xlane.f32.xlu1 %v529_v50 }
 0x37a   :  { %1897 = vperm.xlu1 %3415, %v1892_v51  }
 0x37e   :  { %1989 = vperm.xlu1 %3415, %v1986_v52  }
 0x382   :  { %3416 = vset.pattern.permute.xlu1 %v3731_v32 }
 0x3f6   :  { %v531_v53 = vpop.xlane.xlu1 %530 }
 0x3f7   :  { %v532_v54 = vsub.f32 %v528_v49, %v531_v53 }
 0x3f9   :  { %v533_v55 = vmul.f32 1.442695, %v532_v54 }
 0x3fb   :  { %3418 = vpow2.f32 %v533_v55  ;;  %v2745_v55 = vld [vmem:[%s4469_s8 + $0x20] sm:$0xff] }
 0x405   :  { %v3419_v56 = vpop.eup %3418 }
 0x406   :  { %v535_v57 = vmul.f32 %v3419_v56, %v361_v46  ;;  %v776_v46 = vld [vmem:[%s4469_s8 + $0x18] sm:$0xff]  ;;  %v2746_v56 = vld [vmem:[%s4469_s8 + $0x28] sm:$0xff] }
 0x407   :  { %v4181_v48 = vpack.c.bf16 %v776_v46, %v775_v45 }
 0x408   :  { %v536_v58 = vsel %vm286_vm5, %v535_v57, 0.0 }
 0x409   :  { %537 = vadd.xlane.f32.xlu0 %v536_v58  ;;  %v2747_v58 = vld [vmem:[%s4469_s8 + $0x30] sm:$0xff] }
 0x41f   :  { %1894 = vperm.xlu0 %3413, %v1891_v59   ;;  %v2748_v59 = vld [vmem:[%s4469_s8 + $0x38] sm:$0xff] }
 0x420   :  { %v4206_v62 = vpack.c.bf16 %v2748_v59, %v2747_v58 }
 0x423   :  { %1992 = vperm.xlu0 %3413, %v1987_v60  }
 0x427   :  { %3417 = vset.pattern.permute.xlu0 %v3731_v32  ;;  %v4140_v32 = vpack.c.bf16 %v1033_v31, %v1032_v30  ;;  %v4259_v31 = vld [vmem:[#allocation10 + $0x1] ss:$0 sm:$0xff] }
 0x496   :  { %v538_v0 = vpop.xlane.xlu0 %537 }
 0x497   :  { %v539_v3 = vadd.f32 1e-16, %v538_v0  ;;  %v2755_v0 = vld [vmem:[%s4469_s8 + $0x48] sm:$0xff] }
 0x499   :  { %3420 = vrcp.f32 %v539_v3  ;;  %v4218_v3 = vpack.c.bf16 %v2755_v0, %v2754_v63 }
 0x4a3   :  { %v3421_v5 = vpop.eup %3420 }
 0x4a4   :  { %v541_v6 = vmul.f32 %v3421_v5, %v535_v57  ;;  %v4196_v57 = vpack.c.bf16 %v2746_v56, %v2745_v55  ;;  %v2756_v5 = vld [vmem:[%s4469_s8 + $0x50] sm:$0xff]  ;;  %v4267_v56 = vld [vmem:[#allocation10 + $0x2] ss:$0 sm:$0xff] }
 0x4a6   :  { %2984 = vmatmul.mubr.msk.f32.vlgmr.msra.gmra.mrb[4].mxu1 %vm286_vm5, %v541_v6  ;;  %v2757_v6 = vld [vmem:[%s4469_s8 + $0x58] sm:$0xff]  ;;  %s3634_s8 = scalar_lea.vmem %s2697_s18, 16 }
 0x4a7   :  { %2999 = vmatprep.mubr.msk.f32.mxu1 %vm3729_vm0, %v3728_v2  ;;  %v4229_v7 = vpack.c.bf16 %v2757_v6, %v2756_v5  ;;  %p3635_p8 = scmp.ne.s32.totalorder %s2697_s18, %s3634_s8  ;;  %p3640_p10 = scmp.lt.s32.totalorder %s3638_s30, %s3634_s8 }
 0x4a9   :  { %p3641_p11 = por %p3640_p10, %p3639_p9 }
 0x4ab   :  { %p3642_p12 = pnand %p3641_p11, %p3635_p8 }
 0x579   :  { %v618_v17 = vpop.f32.mrb[4].mxu1 }
 0x57a   :  { %v619_v19 = vadd.f32 %v2736_v12, %v618_v17  ;;  %v2985_v20 = vpop.f32.mrb[5].mxu1  ;;  %v2764_v12 = vld [vmem:[%s4511_s3 + $0x30] sm:$0xff] }
 0x57b   :  { %v3294_v17 = vpack.c.bf16 %v2765_v15, %v2764_v12 }
 0x57c   :  { %v4123_v22 = vmax.f32 %v619_v19, 0.0  ;;  %v4253_v19 = vld [vmem:[#allocation10] ss:$0 sm:$0xff] }
 0x57e   :  { %2995 = vmatmul.mubr.msk.f32.vlgmr.msra.gmra.mrb[4].mxu0 %vm366_vm6, %v4123_v22 }
 0x57f   :  { %3262 = vmatpush3.bf16.msra.mxu0 %v4121_v21  ;;  %3021 = vmatprep.mubr.msk.f32.mxu0 %vm3729_vm0, %v3728_v2 }
 0x580   :  { %3263 = vmatprep.subr.bf16.mxu0 %v3727_v1 }
 0x583   :  { %3265 = vmatpush3.bf16.msra.mxu0 %v4128_v25 }
 0x584   :  { %3272 = vmatprep.subr.bf16.mxu0 %v3727_v1 }
 0x586   :  { %3022 = vmatmul.mubr.msk.f32.vlgmr.msra.gmra.mrb[6].mxu0 %vm366_vm6, %v4123_v22 }
 0x587   :  { %3274 = vmatpush3.bf16.msra.mxu0 %v4134_v28  ;;  %3043 = vmatprep.mubr.msk.f32.mxu0 %vm3729_vm0, %v3728_v2 }
 0x588   :  { %3275 = vmatprep.subr.bf16.mxu0 %v3727_v1 }
 0x58b   :  { %3277 = vmatpush3.bf16.msra.mxu0 %v4140_v32 }
 0x58c   :  { %3284 = vmatprep.subr.bf16.mxu0 %v3727_v1 }
 0x58e   :  { %3044 = vmatmul.mubr.msk.f32.vlgmr.msra.gmra.mrb[8].mxu0 %vm366_vm6, %v4123_v22 }
 0x58f   :  { %3286 = vmatpush3.bf16.msra.mxu0 %v4146_v35  ;;  %3065 = vmatprep.mubr.msk.f32.mxu0 %vm3729_vm0, %v3728_v2 }
 0x590   :  { %3287 = vmatprep.subr.bf16.mxu0 %v3727_v1 }
 0x593   :  { %3289 = vmatpush3.bf16.msra.mxu0 %v4152_v39 }
 0x594   :  { %3079 = vmatprep.subr.mxu0 %v3728_v2 }
 0x596   :  { %3066 = vmatmul.mubr.msk.f32.vlgmr.msra.gmra.mrb[10].mxu0 %vm366_vm6, %v4123_v22 }
 0x597   :  { %3081 = vmatprep.mubr.msk.f32.mxu0 %vm3729_vm0, %v3728_v2 }
 0x651   :  { %v696_v44 = vpop.f32.mrb[4].mxu0 }
 0x652   :  { %v2996_v47 = vpop.f32.mrb[5].mxu0  ;;  %2998 = vmatpush3.msra.mxu1 %v696_v44 }
 0x653   :  { %3000 = vmatmul.mubr.msk.f32.vlgmr.msra.gmra.mrb[6].mxu1 %vm286_vm5, %v4077_v36  ;;  %3254 = vmatprep.subr.bf16.mxu1 %v3727_v1 }
 0x654   :  { %3256 = vmatpush3.bf16.msra.mxu1 %v4169_v43  ;;  %3010 = vmatprep.mubr.msk.f32.mxu1 %vm3729_vm0, %v3728_v2 }
 0x655   :  { %3257 = vmatprep.subr.bf16.mxu1 %v3727_v1 }
 0x658   :  { %3259 = vmatpush3.bf16.msra.mxu1 %v4181_v48 }
 0x659   :  { %v927_v49 = vpop.f32.mrb[6].mxu0  ;;  %3266 = vmatprep.subr.bf16.mxu1 %v3727_v1 }
 0x65a   :  { %v3023_v50 = vpop.f32.mrb[7].mxu0 }
 0x661   :  { %v1100_v51 = vpop.f32.mrb[8].mxu0 }
 0x662   :  { %v3045_v52 = vpop.f32.mrb[9].mxu0 }
 0x669   :  { %v4188_v53 = vpop.f32.mrb[10].mxu0 }
 0x66a   :  { %v3067_v54 = vpop.f32.mrb[11].mxu0 }
 0x66b   :  { %v4265_v54 = vld [vmem:[#allocation11 + $0x2] ss:$0 sm:$0xff] }
 0x66c   :  { %v1283_v58 = vadd.f32 %v4265_v54, %v4188_v53  ;;  %v1898_v53 = vpop.permute.xlu1 %1897 }
 0x66d   :  { %vm1900_vm14 = vcmp.eq.s32.totalorder %v1898_v53, %v4048_v18 }
 0x726   :  { %v769_v60 = vpop.f32.mrb[6].mxu1 }
 0x727   :  { %v3001_v61 = vpop.f32.mrb[7].mxu1  ;;  %3011 = vmatmul.mubr.msk.f32.vlgmr.msra.gmra.mrb[8].mxu1 %vm366_vm6, %v769_v60 }
 0x728   :  { %3268 = vmatpush3.bf16.msra.mxu1 %v4196_v57  ;;  %3032 = vmatprep.mubr.msk.f32.mxu1 %vm3729_vm0, %v3728_v2 }
 0x729   :  { %3269 = vmatprep.subr.bf16.mxu1 %v3727_v1 }
 0x72c   :  { %3271 = vmatpush3.bf16.msra.mxu1 %v4206_v62 }
 0x72d   :  { %3278 = vmatprep.subr.bf16.mxu1 %v3727_v1 }
 0x72f   :  { %3033 = vmatmul.mubr.msk.f32.vlgmr.msra.gmra.mrb[10].mxu1 %vm366_vm6, %v769_v60 }
 0x730   :  { %3280 = vmatpush3.bf16.msra.mxu1 %v4218_v3  ;;  %3054 = vmatprep.mubr.msk.f32.mxu1 %vm3729_vm0, %v3728_v2 }
 0x731   :  { %3281 = vmatprep.subr.bf16.mxu1 %v3727_v1 }
 0x734   :  { %3283 = vmatpush3.bf16.msra.mxu1 %v4229_v7 }
 0x735   :  { %3290 = vmatprep.subr.bf16.mxu1 %v3727_v1 }
 0x737   :  { %3055 = vmatmul.mubr.msk.f32.vlgmr.msra.gmra.mrb[12].mxu1 %vm366_vm6, %v769_v60 }
 0x738   :  { %3076 = vmatprep.mubr.msk.f32.mxu1 %vm3729_vm0, %v3728_v2  ;;  %3292 = vmatpush3.bf16.msra.mxu1 %v3291_v14 }
 0x739   :  { %3293 = vmatprep.subr.bf16.mxu1 %v3727_v1 }
 0x73c   :  { %3295 = vmatpush3.bf16.msra.mxu1 %v3294_v17 }
 0x73d   :  { %3302 = vmatprep.subr.bf16.mxu1 %v3727_v1 }
 0x7fa   :  { %v853_v20 = vpop.f32.mrb[8].mxu1 }
 0x7fb   :  { %v854_v23 = vadd.f32 %v4253_v19, %v853_v20  ;;  %v3012_v24 = vpop.f32.mrb[9].mxu1 }
 0x7fc   :  { %v2100_v24 = vld [vmem:[%s4476_s15 + $0x18] sm:$0xff] }
 0x7fd   :  { %v931_v27 = vadd.f32 %v927_v49, %v854_v23 }
 0x7ff   :  { %v939_v30 = vadd.f32 %v4256_v26, %v931_v27 }
 0x801   :  { %v2744_v33 = vmul.f32 -1.442695, %v939_v30 }
 0x802   :  { %v1025_v34 = vpop.f32.mrb[10].mxu1 }
 0x803   :  { %3422 = vpow2.f32 %v2744_v33  ;;  %v1026_v37 = vadd.f32 %v4259_v31, %v1025_v34  ;;  %v3034_v38 = vpop.f32.mrb[11].mxu1 }
 0x805   :  { %v1104_v41 = vadd.f32 %v1100_v51, %v1026_v37 }
 0x807   :  { %v1113_v44 = vadd.f32 %v4262_v40, %v1104_v41 }
 0x809   :  { %v2753_v45 = vmul.f32 -1.442695, %v1113_v44 }
 0x80a   :  { %v1199_v46 = vpop.f32.mrb[12].mxu1 }
 0x80b   :  { %3424 = vpow2.f32 %v2753_v45  ;;  %v3056_v47 = vpop.f32.mrb[13].mxu1  ;;  %v1200_v51 = vadd.f32 %v4267_v56, %v1199_v46 }
 0x80d   :  { %v3423_v49 = vpop.eup %3422 }
 0x80e   :  { %v943_v50 = vadd.f32 1.0, %v3423_v49 }
 0x810   :  { %3426 = vrcp.f32 %v943_v50 }
 0x815   :  { %v3425_v52 = vpop.eup %3424 }
 0x816   :  { %v1117_v55 = vadd.f32 1.0, %v3425_v52 }
 0x818   :  { %3428 = vrcp.f32 %v1117_v55 }
 0x81a   :  { %v3427_v59 = vpop.eup %3426 }
 0x81b   :  { %v1286_v60 = vmul.f32 %v3427_v59, %v1283_v58 }
 0x81d   :  { %v1287_v61 = vadd.f32 %v1286_v60, %v1200_v51 }
 0x81f   :  { %3430 = vtanh.f32 %v1287_v61 }
 0x822   :  { %v3429_v63 = vpop.eup %3428 }
 0x823   :  { %v1289_v0 = vsub.f32 1.0, %v3429_v63  ;;  %v1291_v8 = vmul.f32 %v3429_v63, %v4123_v22  ;;  %v1895_v22 = vpop.permute.xlu0 %1894 }
 0x824   :  { %vm1899_vm13 = vcmp.eq.s32.totalorder %v1895_v22, %v4048_v18 }
 0x829   :  { %v3431_v5 = vpop.eup %3430 }
 0x82a   :  { %v1290_v6 = vmul.f32 %v3431_v5, %v1289_v0 }
 0x82c   :  { %v4273_v11 = vadd.f32 %v1291_v8, %v1290_v6 }
 0x82e   :  { %3077 = vmatmul.mubr.msk.f32.vlgmr.msra.gmra.mrb[14].mxu1 %vm366_vm6, %v4273_v11 }
 0x82f   :  { %3304 = vmatpush3.bf16.msra.mxu1 %v4121_v21  ;;  %3103 = vmatprep.mubr.msk.f32.mxu1 %vm3729_vm0, %v3728_v2  ;;  %v1993_v21 = vpop.permute.xlu0 %1992 }
 0x830   :  { %3305 = vmatprep.subr.bf16.mxu1 %v3727_v1  ;;  %vm1995_vm10 = vcmp.eq.s32.totalorder %v1993_v21, %v4048_v18 }
 0x833   :  { %3307 = vmatpush3.bf16.msra.mxu1 %v4128_v25  ;;  %v1990_v25 = vpop.permute.xlu1 %1989 }
 0x834   :  { %3314 = vmatprep.subr.bf16.mxu1 %v3727_v1  ;;  %vm1994_vm11 = vcmp.eq.s32.totalorder %v1990_v25, %v4048_v18 }
 0x835   :  { %vm3348_vm12 = vmpackc.low %vm1995_vm10, %vm1994_vm11 }
 0x836   :  { %3104 = vmatmul.mubr.msk.f32.vlgmr.msra.gmra.mrb[16].mxu1 %vm366_vm6, %v4273_v11 }
 0x837   :  { %3316 = vmatpush3.bf16.msra.mxu1 %v4134_v28  ;;  %3125 = vmatprep.mubr.msk.f32.mxu1 %vm3729_vm0, %v3728_v2  ;;  %v3732_v28 = vmov 1.0|1.0  }
 0x838   :  { %3317 = vmatprep.subr.bf16.mxu1 %v3727_v1 }
 0x83b   :  { %3319 = vmatpush3.bf16.msra.mxu1 %v4140_v32 }
 0x83c   :  { %3326 = vmatprep.subr.bf16.mxu1 %v3727_v1 }
 0x83e   :  { %3126 = vmatmul.mubr.msk.f32.vlgmr.msra.gmra.mrb[18].mxu1 %vm366_vm6, %v4273_v11 }
 0x83f   :  { %3328 = vmatpush3.bf16.msra.mxu1 %v4146_v35  ;;  %3147 = vmatprep.mubr.msk.f32.mxu1 %vm3729_vm0, %v3728_v2 }
 0x840   :  { %3329 = vmatprep.subr.bf16.mxu1 %v3727_v1 }
 0x843   :  { %3331 = vmatpush3.bf16.msra.mxu1 %v4152_v39 }
 0x844   :  { %3349 = vmatprep.subr.msk.bf16.mxu1 %vm3348_vm12, %v3732_v28 }
 0x846   :  { %3148 = vmatmul.mubr.msk.f32.vlgmr.msra.gmra.mrb[20].mxu1 %vm366_vm6, %v4273_v11 }
 0x847   :  { %3351 = vmatpush3.bf16.msk.msra.mxu1 %vm3348_vm12, %v3732_v28 }
 0x901   :  { %v1367_v32 = vpop.f32.mrb[14].mxu1 }
 0x902   :  { %v3078_v35 = vpop.f32.mrb[15].mxu1  ;;  %3080 = vmatpush3.msra.mxu0 %v1367_v32 }
 0x903   :  { %3082 = vmatmul.mubr.msk.f32.vlgmr.msra.gmra.mrb[12].mxu0 %vm286_vm5, %v4077_v36  ;;  %3296 = vmatprep.subr.bf16.mxu0 %v3727_v1 }
 0x904   :  { %3298 = vmatpush3.bf16.msra.mxu0 %v4169_v43  ;;  %3092 = vmatprep.mubr.msk.f32.mxu0 %vm3729_vm0, %v3728_v2  ;;  %v2776_v43 = vsel %vm1899_vm13, 1.0, %v3728_v2 }
 0x905   :  { %3299 = vmatprep.subr.bf16.mxu0 %v3727_v1 }
 0x908   :  { %3301 = vmatpush3.bf16.msra.mxu0 %v4181_v48  ;;  %v2777_v48 = vsel %vm1900_vm14, 1.0, %v3728_v2 }
 0x909   :  { %v1580_v39 = vpop.f32.mrb[16].mxu1  ;;  %3308 = vmatprep.subr.bf16.mxu0 %v3727_v1 }
 0x90a   :  { %v3105_v12 = vpop.f32.mrb[17].mxu1 }
 0x911   :  { %v1728_v14 = vpop.f32.mrb[18].mxu1 }
 0x912   :  { %v3127_v15 = vpop.f32.mrb[19].mxu1 }
 0x919   :  { %v4311_v17 = vpop.f32.mrb[20].mxu1 }
 0x91a   :  { %v3149_v36 = vpop.f32.mrb[21].mxu1 }
 0x9d6   :  { %v1437_v20 = vpop.f32.mrb[12].mxu0 }
 0x9d7   :  { %v3083_v23 = vpop.f32.mrb[13].mxu0  ;;  %3093 = vmatmul.mubr.msk.f32.vlgmr.msra.gmra.mrb[14].mxu0 %vm366_vm6, %v1437_v20 }
 0x9d8   :  { %3310 = vmatpush3.bf16.msra.mxu0 %v4196_v57  ;;  %3114 = vmatprep.mubr.msk.f32.mxu0 %vm3729_vm0, %v3728_v2  ;;  %v2098_v57 = vld [vmem:[%s4476_s15 + $0x8] sm:$0xff] }
 0x9d9   :  { %3311 = vmatprep.subr.bf16.mxu0 %v3727_v1 }
 0x9dc   :  { %3313 = vmatpush3.bf16.msra.mxu0 %v4206_v62 }
 0x9dd   :  { %3320 = vmatprep.subr.bf16.mxu0 %v3727_v1 }
 0x9df   :  { %3115 = vmatmul.mubr.msk.f32.vlgmr.msra.gmra.mrb[16].mxu0 %vm366_vm6, %v1437_v20 }
 0x9e0   :  { %3322 = vmatpush3.bf16.msra.mxu0 %v4218_v3  ;;  %3136 = vmatprep.mubr.msk.f32.mxu0 %vm3729_vm0, %v3728_v2 }
 0x9e1   :  { %3323 = vmatprep.subr.bf16.mxu0 %v3727_v1 }
 0x9e4   :  { %3325 = vmatpush3.bf16.msra.mxu0 %v4229_v7  ;;  %v2099_v7 = vld [vmem:[%s4476_s15 + $0x10] sm:$0xff] }
 0x9e5   :  { %3333 = vmatprep.subr.bf16.mxu0 %v4016_v9  ;;  %v3356_v27 = vpack.c.bf16 %v2100_v24, %v2099_v7 }
 0x9e7   :  { %3137 = vmatmul.mubr.msk.f32.vlgmr.msra.gmra.mrb[18].mxu0 %vm366_vm6, %v1437_v20 }
 0x9e8   :  { %3335 = vmatpush3.bf16.msra.mxu0 %v4016_v9  ;;  %3166 = vmatprep.mubr.msk.f32.mxu0 %vm195_vm1, %v2776_v43  ;;  %v4342_v9 = vadd.s32 8, %v4059_v29 }
 0x9e9   :  { %3337 = vmatprep.subr.bf16.mxu0 %v4023_v10 }
 0x9ec   :  { %3339 = vmatpush3.bf16.msra.mxu0 %v4023_v10  ;;  %v2782_v10 = vld [vmem:[%s4475_s14] ss:$0 sm:$0xff] }
 0x9ed   :  { %3341 = vmatprep.subr.bf16.mxu0 %v4033_v13  ;;  %vm2006_vm15 = vcmp.eq.s32.totalorder %v4059_v29, %v2782_v10 }
 0x9ee   :  { %v2783_v62 = vsel %vm2006_vm15, 1.0, %v3728_v2 }
 0x9ef   :  { %3173 = vmatprep.mubr.msk.f32.mxu1 %vm2012_vm2, %v2783_v62 }
 0x9f0   :  { %3343 = vmatpush3.bf16.msra.mxu0 %v4033_v13  ;;  %v2097_v13 = vld [vmem:[%s4476_s15] sm:$0xff] }
 0x9f1   :  { %3345 = vmatprep.subr.bf16.mxu0 %v4043_v16 }
 0x9f4   :  { %3347 = vmatpush3.bf16.msra.mxu0 %v4043_v16  ;;  %v3352_v16 = vpack.c.bf16 %v2098_v57, %v2097_v13 }
 0x9f6   :  { %3353 = vmatprep.subr.bf16.mxu1 %v3352_v16 }
 0x9f7   :  { %3167 = vmatmul.mubr.msk.f32.vlgmr.msra.gmra.mrb[20].mxu0 %vm195_vm1, %v2777_v48  ;;  %vm2007_vm1 = vcmp.eq.s32.totalorder %v4342_v9, %v2782_v10 }
 0x9f8   :  { %v2784_v3 = vsel %vm2007_vm1, 1.0, %v3728_v2 }
 0x9f9   :  { %3174 = vmatmul.mubr.msk.f32.vlgmr.msra.gmra.mrb[22].mxu1 %vm2012_vm2, %v2784_v3 }
 0x9fa   :  { %3355 = vmatpush3.bf16.msra.mxu1 %v3352_v16 }
 0x9fb   :  { %3357 = vmatprep.subr.bf16.mxu1 %v3356_v27 }
 0x9fe   :  { %3359 = vmatpush3.bf16.msra.mxu1 %v3356_v27 }
 0x9ff   :  { %3360 = vmatprep.subr.bf16.mxu1 %v3727_v1 }
 0xaaa   :  { %v1510_v30 = vpop.f32.mrb[14].mxu0 }
 0xaab   :  { %v1511_v33 = vadd.f32 %v4253_v19, %v1510_v30  ;;  %v3094_v34 = vpop.f32.mrb[15].mxu0 }
 0xaad   :  { %v1584_v37 = vadd.f32 %v1580_v39, %v1511_v33 }
 0xaaf   :  { %v1585_v38 = vadd.f32 %v4256_v26, %v1584_v37  ;;  %v1877_v26 = vadd.f32 %v4265_v54, %v4311_v17  ;;  %v2182_v54 = vld [vmem:[%s4477_s16] sm:$0x1] }
 0xab1   :  { %v2770_v41 = vmul.f32 -1.442695, %v1585_v38 }
 0xab2   :  { %v1658_v44 = vpop.f32.mrb[16].mxu0 }
 0xab3   :  { %3432 = vpow2.f32 %v2770_v41  ;;  %v1659_v45 = vadd.f32 %v4259_v31, %v1658_v44  ;;  %v3116_v46 = vpop.f32.mrb[17].mxu0 }
 0xab5   :  { %v1732_v47 = vadd.f32 %v1728_v14, %v1659_v45 }
 0xab7   :  { %v1733_v49 = vadd.f32 %v4262_v40, %v1732_v47 }
 0xab9   :  { %v2773_v50 = vmul.f32 -1.442695, %v1733_v49 }
 0xaba   :  { %v1806_v52 = vpop.f32.mrb[18].mxu0 }
 0xabb   :  { %3434 = vpow2.f32 %v2773_v50  ;;  %v3138_v1 = vpop.f32.mrb[19].mxu0  ;;  %v1807_v31 = vadd.f32 %v4267_v56, %v1806_v52 }
 0xabd   :  { %v3433_v55 = vpop.eup %3432 }
 0xabe   :  { %v1589_v58 = vadd.f32 1.0, %v3433_v55 }
 0xac0   :  { %3436 = vrcp.f32 %v1589_v58 }
 0xac5   :  { %v3435_v19 = vpop.eup %3434 }
 0xac6   :  { %v1737_v59 = vadd.f32 1.0, %v3435_v19 }
 0xac8   :  { %3438 = vrcp.f32 %v1737_v59 }
 0xaca   :  { %v3437_v51 = vpop.eup %3436  ;;  %v3168_v60 = vpop.f32.mrb[20].mxu0 }
 0xacb   :  { %v1880_v61 = vmul.f32 %v3437_v51, %v1877_v26  ;;  %v1977_v63 = vpop.f32.mrb[21].mxu0  ;;  %v2489_v51 = vld [vmem:[#allocation13] sm:$0xff] }
 0xacc   :  { %v3361_v40 = vpack.c.bf16 %v3168_v60, %v1977_v63  ;;  %3184 = vmatprep.mubr.msk.f32.mxu1 %vm366_vm6, %v1977_v63  ;;  %v4385_v25 = vpop.f32.mrb[22].mxu1  ;;  %v2492_v63 = vld [vmem:[#allocation13 + $0x18] sm:$0xff] }
 0xacd   :  { %v1881_v0 = vadd.f32 %v1880_v61, %v1807_v31  ;;  %3185 = vmatmul.mubr.msk.f32.vlgmr.msra.gmra.mrb[24].mxu1 %vm366_vm6, %v3168_v60  ;;  %v2399_v41 = vsel %vm2012_vm2, %v4385_v25, 0.0  ;;  %v2490_v60 = vld [vmem:[#allocation13 + $0x8] sm:$0xff]  ;;  %v2491_v31 = vld [vmem:[#allocation13 + $0x10] sm:$0xff] }
 0xace   :  { %3363 = vmatpush3.bf16.xpose.msk.msra.mxu1 %vm3362_vm3, %v3361_v40  ;;  %3191 = vmatprep.mubr.msk.f32.mxu1 %vm3729_vm0, %v3728_v2  ;;  %v4387_v2 = vpop.f32.mrb[23].mxu1  ;;  %vm2094_vm0 = vcmp.eq.s32.totalorder %v4342_v9, %v4048_v18  ;;  %v3372_v61 = vpack.c.bf16 %v2490_v60, %v2489_v51  ;;  %v3376_v40 = vpack.c.bf16 %v2492_v63, %v2491_v31 }
 0xacf   :  { %3440 = vtanh.f32 %v1881_v0  ;;  %v2096_v20 = vsel %vm2094_vm0, 1.0, %v4385_v25  ;;  %v2095_v43 = vsel %vm360_vm7, 1.0, %v4387_v2  ;;  %v2396_v44 = vsel %vm2012_vm2, %v4387_v2, 0.0 }
 0xad0   :  { %vm2279_vm8 = vcmp.gt.f32.partialorder %v2096_v20, 0.0  ;;  %vm2278_vm9 = vcmp.gt.f32.partialorder %v2095_v43, 0.0  ;;  %3373 = vmatprep.subr.bf16.mxu1 %v3372_v61  ;;  %vm1889_vm7 = vcmask 253952  }
 0xad1   :  { %1890 = vst.msk [vmem:[#allocation17] sm:$0x1] %vm1889_vm7, %v4001_v4 }
 0xad2   :  { %v3439_v56 = vpop.eup %3438 }
 0xad3   :  { %v1883_v5 = vsub.f32 1.0, %v3439_v56  ;;  %v1885_v22 = vmul.f32 %v3439_v56, %v4273_v11  ;;  %v2794_v56 = vld [vmem:[%s4478_s17] ss:$0 sm:$0xff] }
 0xad5   :  { %3192 = vmatmul.mubr.msk.f32.vlgmr.msra.gmra.mrb[26].mxu1 %vm366_vm6, %v2182_v54 }
 0xad6   :  { %3375 = vmatpush3.bf16.msra.mxu1 %v3372_v61 }
 0xad7   :  { %3377 = vmatprep.subr.bf16.mxu1 %v3376_v40 }
 0xad9   :  { %v3441_v6 = vpop.eup %3440 }
 0xada   :  { %v1884_v8 = vmul.f32 %v3441_v6, %v1883_v5  ;;  %3379 = vmatpush3.bf16.msra.mxu1 %v3376_v40 }
 0xadc   :  { %v1886_v53 = vadd.f32 %v1885_v22, %v1884_v8 }
 0xade   :  { %v1887_v21 = vmax.f32 %v1886_v53, 0.0 }
 0xae0   :  { %1888 = vst.msk [vmem:[#allocation16] sm:$0xff] %vm366_vm6, %v1887_v21 }
 0xba0   :  { %v3186_v28 = vpop.f32.mrb[24].mxu1 }
 0xba1   :  { %2263 = vperm.xlu0 %3417, %v3186_v28   ;;  %v2173_v32 = vpop.f32.mrb[25].mxu1 }
 0xba2   :  { %v3364_v35 = vpack.c.bf16 %v3186_v28, %v2173_v32  ;;  %2258 = vperm.xlu1 %3416, %v2173_v32   ;;  %v2580_v28 = vld [vmem:[#allocation14] sm:$0xff]  ;;  %v2581_v32 = vld [vmem:[#allocation14 + $0x8] sm:$0xff] }
 0xba4   :  { %3365 = vmatprep.subr.bf16.mxu0 %v3364_v35 }
 0xba5   :  { %3367 = vmatpush3.bf16.msra.mxu0 %v3364_v35  ;;  %v3380_v35 = vpack.c.bf16 %v2581_v32, %v2580_v28 }
 0xba7   :  { %3381 = vmatprep.subr.bf16.mxu1 %v3380_v35 }
 0xba8   :  { %v2252_v39 = vpop.f32.mrb[26].mxu1 }
 0xba9   :  { %v3193_v12 = vpop.f32.mrb[27].mxu1  ;;  %v2269_v11 = vrot.slane %v2252_v39, %v521_v42  ;;  %v2582_v39 = vld [vmem:[#allocation14 + $0x10] sm:$0xff] }
 0xbaa   :  { %v2583_v12 = vld [vmem:[#allocation14 + $0x18] sm:$0xff] }
 0xc20   :  { %v2264_v14 = vpop.permute.xlu0 %2263 }
 0xc21   :  { %v2271_v15 = vadd.f32 %v2269_v11, %v2264_v14  ;;  %v2259_v17 = vpop.permute.xlu1 %2258 }
 0xc22   :  { %v2270_v36 = vadd.f32 %v2269_v11, %v2259_v17 }
 0xc23   :  { %v2275_v23 = vmul.f32 0.2, %v2271_v15  ;;  %vm2273_vm4 = vcmp.gt.f32.partialorder %v2271_v15, 0.0 }
 0xc24   :  { %v2274_v48 = vmul.f32 0.2, %v2270_v36  ;;  %vm2272_vm5 = vcmp.gt.f32.partialorder %v2270_v36, 0.0 }
 0xc25   :  { %v2277_v10 = vsel %vm2273_vm4, %v2271_v15, %v2275_v23  ;;  %v3384_v15 = vpack.c.bf16 %v2583_v12, %v2582_v39 }
 0xc26   :  { %v2281_v42 = vsel %vm2279_vm8, %v2277_v10, -1e+30  ;;  %v2276_v13 = vsel %vm2272_vm5, %v2270_v36, %v2274_v48 }
 0xc27   :  { %v2285_v9 = vsel %vm2012_vm2, %v2281_v42, -inf  ;;  %v2280_v57 = vsel %vm2278_vm9, %v2276_v13, -1e+30 }
 0xc28   :  { %2286 = vmax.xlane.f32.xlu0 %v2285_v9  ;;  %v2282_v16 = vsel %vm2012_vm2, %v2280_v57, -inf }
 0xc29   :  { %2283 = vmax.xlane.f32.xlu1 %v2282_v16 }
 0xcb5   :  { %v2287_v62 = vpop.xlane.xlu0 %2286 }
 0xcb6   :  { %v2289_v3 = vsub.f32 %v2281_v42, %v2287_v62  ;;  %v2284_v7 = vpop.xlane.xlu1 %2283 }
 0xcb7   :  { %v2288_v24 = vsub.f32 %v2280_v57, %v2284_v7 }
 0xcb8   :  { %v2292_v18 = vmul.f32 1.442695, %v2289_v3 }
 0xcb9   :  { %v2290_v29 = vmul.f32 1.442695, %v2288_v24 }
 0xcba   :  { %3442 = vpow2.f32 %v2292_v18 }
 0xcbb   :  { %3444 = vpow2.f32 %v2290_v29 }
 0xcc4   :  { %v3443_v27 = vpop.eup %3442 }
 0xcc5   :  { %v3445_v30 = vpop.eup %3444  ;;  %v2295_v33 = vmul.f32 %v3443_v27, %v2096_v20 }
 0xcc6   :  { %v2294_v34 = vmul.f32 %v3445_v30, %v2095_v43 }
 0xcc7   :  { %v2299_v37 = vsel %vm2012_vm2, %v2295_v33, 0.0 }
 0xcc8   :  { %2300 = vadd.xlane.f32.xlu0 %v2299_v37  ;;  %v2296_v38 = vsel %vm2012_vm2, %v2294_v34, 0.0 }
 0xcc9   :  { %2297 = vadd.xlane.f32.xlu1 %v2296_v38 }
 0xccc   :  { %2400 = vadd.xlane.f32.xlu0 %v2399_v41 }
 0xccd   :  { %2397 = vadd.xlane.f32.xlu1 %v2396_v44 }
 0xd55   :  { %v2301_v45 = vpop.xlane.xlu0 %2300 }
 0xd56   :  { %v2303_v46 = vadd.f32 1e-16, %v2301_v45  ;;  %v2298_v47 = vpop.xlane.xlu1 %2297 }
 0xd57   :  { %v2302_v49 = vadd.f32 1e-16, %v2298_v47 }
 0xd58   :  { %3446 = vrcp.f32 %v2303_v46 }
 0xd59   :  { %3448 = vrcp.f32 %v2302_v49  ;;  %v2401_v0 = vpop.xlane.xlu0 %2400 }
 0xd5a   :  { %v2398_v50 = vpop.xlane.xlu1 %2397  ;;  %v2403_v54 = vmax.f32 %v2401_v0, 1.0 }
 0xd5b   :  { %v2402_v52 = vmax.f32 %v2398_v50, 1.0 }
 0xd5d   :  { %3450 = vrcp.f32 %v2402_v52 }
 0xd5e   :  { %3452 = vrcp.f32 %v2403_v54 }
 0xd62   :  { %v3447_v1 = vpop.eup %3446 }
 0xd63   :  { %v3449_v55 = vpop.eup %3448  ;;  %v2307_v19 = vmul.f32 %v3447_v1, %v2295_v33 }
 0xd64   :  { %v2305_v58 = vmul.f32 %v3449_v55, %v2294_v34 }
 0xd66   :  { %3198 = vmatprep.mubr.msk.f32.mxu0 %vm2012_vm2, %v2305_v58 }
 0xd67   :  { %v3451_v59 = vpop.eup %3450  ;;  %3199 = vmatmul.mubr.msk.f32.vlgmr.msra.gmra.mrb[22].mxu0 %vm2012_vm2, %v2307_v19 }
 0xd68   :  { %v2405_v26 = vmul.f32 %v3451_v59, %v4387_v2  ;;  %v3453_v21 = vpop.eup %3452 }
 0xd69   :  { %v2407_v2 = vmul.f32 %v3453_v21, %v4385_v25  ;;  %v2799_v25 = vld [vmem:[%s4480_s19] ss:$0 sm:$0xff] }
 0xd6a   :  { %3205 = vmatprep.mubr.msk.f32.mxu0 %vm2012_vm2, %v2405_v26 }
 0xe3a   :  { %v3200_v5 = vpop.f32.mrb[22].mxu0 }
 0xe3b   :  { %v2393_v6 = vadd.f32 %v3200_v5, %v2794_v56  ;;  %v2387_v8 = vpop.f32.mrb[23].mxu0 }
 0xe3c   :  { %v2388_v22 = vadd.f32 %v2794_v56, %v2387_v8 }
 0xe3e   :  { %v3368_v53 = vpack.c.bf16 %v2393_v6, %v2388_v22 }
 0xe40   :  { %3369 = vmatprep.subr.bf16.mxu0 %v3368_v53 }
 0xe41   :  { %3371 = vmatpush3.bf16.msra.mxu0 %v3368_v53 }
 0xe44   :  { %3206 = vmatmul.mubr.msk.f32.vlgmr.msra.gmra.mrb[24].mxu0 %vm2012_vm2, %v2407_v2 }
 0xf17   :  { %v3207_v11 = vpop.f32.mrb[24].mxu0 }
 0xf18   :  { %v2480_v14 = vpop.f32.mrb[25].mxu0 }
 0xf19   :  { %3216 = vmatprep.mubr.msk.f32.mxu1 %vm366_vm6, %v2480_v14 }
 0xf1a   :  { %3217 = vmatmul.mubr.msk.f32.vlgmr.msra.gmra.mrb[28].mxu1 %vm366_vm6, %v3207_v11 }
 0xf1b   :  { %3383 = vmatpush3.bf16.msra.mxu1 %v3380_v35  ;;  %3227 = vmatprep.mubr.msk.f32.mxu1 %vm366_vm6, %v2388_v22 }
 0xf1c   :  { %3385 = vmatprep.subr.bf16.mxu1 %v3384_v15 }
 0xf1f   :  { %3387 = vmatpush3.bf16.msra.mxu1 %v3384_v15 }
 0xf22   :  { %3228 = vmatmul.mubr.msk.f32.vlgmr.msra.gmra.mrb[28].mxu1 %vm366_vm6, %v2393_v6 }
 0xff5   :  { %v3229_v17 = vpop.f32.mrb[28].mxu1 }
 0xff6   :  { %v2656_v36 = vpop.f32.mrb[29].mxu1 }
 0xff7   :  { %v3388_v20 = vadd.f32 %v2799_v25, %v2656_v36 }
 0xff9   :  { %v2665_v23 = vmul.f32 %v3388_v20, %v3388_v20 }
 0xffb   :  { %v2666_v43 = vsel %vm366_vm6, %v2665_v23, 0.0 }
 0xffc   :  { %2667 = vadd.xlane.f32.xlu1 %v2666_v43 }
 0xffd   :  { %3645 = shalt.err (!%p3642_p12)
}
 0xffe   :  { %s3646_s23 = scalar_lea.hbm %s4483_s22, 16 }
 0xfff   :  { %p3647_p13 = scmp.ne.s32.totalorder %s4483_s22, %s3646_s23  ;;  %p3650_p0 = scmp.lt.u32.totalorder %s3646_s23, %s4483_s22 }
0x1001   :  { %p3652_p1 = pnand %p3650_p0, %p3647_p13 }
0x1003   :  { %3655 = shalt.err (!%p3652_p1)
}
0x1004   :  { %2699 = dma.vmem_to_hbm [thread:$0]  %s2697_s18, 16, %s4483_s22, [#allocation18]  }
0x1005   :  { %s3656_s1 = scalar_lea.vmem %s2687_s20, 128  ;;  %p3661_p3 = scmp.lt.s32.totalorder %s2687_s20, %s2687_s20 }
0x1006   :  { %p3657_p2 = scmp.ne.s32.totalorder %s2687_s20, %s3656_s1  ;;  %p3662_p4 = scmp.lt.s32.totalorder %s3656_s1, %s3656_s1 }
0x1008   :  { %p3663_p5 = por %p3662_p4, %p3661_p3 }
0x100a   :  { %p3664_p6 = pnand %p3663_p5, %p3657_p2 }
0x100c   :  { %3667 = shalt.err (!%p3664_p6)
}
0x100d   :  { %s3668_s25 = scalar_lea.hbm %s4482_s21, 128 }
0x100e   :  { %p3669_p7 = scmp.ne.s32.totalorder %s4482_s21, %s3668_s25  ;;  %p3672_p8 = scmp.lt.u32.totalorder %s3668_s25, %s4482_s21 }
0x1010   :  { %p3674_p9 = pnand %p3672_p8, %p3669_p7 }
0x1012   :  { %3677 = shalt.err (!%p3674_p9)
}
0x1013   :  { %2689 = dma.vmem_to_hbm [thread:$0]  %s2687_s20, 128, %s4482_s21, [#allocation4]  }
0x1014   :  { %s3735_s28 = smov [#allocation19]  }
0x1015   :  { %s2706_s16 = sshll.u32 %s3735_s28, 4  ;;  %s2707_s16 = int_to_ptr.vmem [resolvable:$true] %s2706_s16 }
0x1016   :  { %s3678_s12 = scalar_lea.vmem %s2707_s16, 128  ;;  %p3683_p11 = scmp.lt.s32.totalorder %s2707_s16, %s2707_s16 }
0x1017   :  { %p3679_p10 = scmp.ne.s32.totalorder %s2707_s16, %s3678_s12  ;;  %p3684_p12 = scmp.lt.s32.totalorder %s3678_s12, %s3678_s12 }
0x1019   :  { %p3685_p13 = por %p3684_p12, %p3683_p11 }
0x101b   :  { %p3686_p0 = pnand %p3685_p13, %p3679_p10 }
0x1089   :  { %v2668_v4 = vpop.xlane.xlu1 %2667 }
0x108a   :  { %3454 = vrsqrt.f32 %v2668_v4  ;;  %vm2671_vm10 = vcmp.eq.f32.partialorder %v2668_v4, inf  ;;  %v2674_v42 = vand.u32 2147483648, %v2668_v4  ;;  %vm2673_vm11 = vcmp.eq.f32.partialorder %v2668_v4, 0.0 }
0x1094   :  { %v3455_v48 = vpop.eup %3454 }
0x1095   :  { %v2670_v10 = vmul.f32 %v3455_v48, %v2668_v4 }
0x1097   :  { %v2672_v13 = vsel %vm2671_vm10, %v2668_v4, %v2670_v10 }
0x1098   :  { %v2675_v9 = vsel %vm2673_vm11, %v2674_v42, %v2672_v13 }
0x1099   :  { %v2676_v57 = vmax.f32 %v2675_v9, 1e-12 }
0x109b   :  { %3456 = vrcp.f32 %v2676_v57 }
0x10a5   :  { %v3457_v16 = vpop.eup %3456 }
0x10a6   :  { %v2678_v62 = vmul.f32 %v3457_v16, %v3388_v20 }
0x10a8   :  { %2679 = vst.msk [vmem:[#allocation19] sm:$0xff] %vm366_vm6, %v2678_v62 }
0x10a9   :  { %3689 = shalt.err (!%p3686_p0)
}
0x10aa   :  { %s4512_s13 = sld [smem:[#allocation35_spill]] }
0x10b0   :  { %s3690_s29 = scalar_lea.hbm %s4512_s13, 128 }
0x10b1   :  { %p3691_p1 = scmp.ne.s32.totalorder %s4512_s13, %s3690_s29  ;;  %p3694_p2 = scmp.lt.u32.totalorder %s3690_s29, %s4512_s13 }
0x10b3   :  { %p3696_p3 = pnand %p3694_p2, %p3691_p1 }
0x10b5   :  { %3699 = shalt.err (!%p3696_p3)
}
0x10b6   :  { %2709 = dma.vmem_to_hbm [thread:$0]  %s2707_s16, 128, %s4512_s13, [#allocation18]  }
0x10b7   :  { %3710 = dma.done.wait [#allocation4], 128  }
0x10b8   :  { %3711 = vsyncadd [#allocation4], 4294967168 }
0x10b9   :  { %3712 = dma.done.wait [#allocation18], 144  }
0x10ba   :  { %3713 = vsyncadd [#allocation18], 4294967152 }
0x10bb   :  { %2719 = vsyncpa [#allocation3], 1 }
0x10bc   :  { %2720 = vsyncpa [#allocation6], 1 }
0x10bd   :  { %2721 = vsyncpa [#allocation9], 1 }
0x10be   :  { %2722 = vsyncpa [#allocation12], 1 }
0x10bf   :  { %2723 = vsyncpa [#allocation15], 1 }
0x10c0   :  { %2724 = vsyncpa [#allocation4], 1 }
0x10c1   :  { %2725 = vsyncpa [#allocation18], 1 }

</bundles_post_ra>
